<compile_context>
chip_gen: v5e
topology: v5e:2x2
jax: 0.10.0
libtpu: 0.0.40
codegen_flags: <defaults>
</compile_context>

<pallas_src>
import functools

import jax
import jax.numpy as jnp
from jax import lax
from jax.experimental import pallas as pl
from jax.experimental.pallas import tpu as pltpu


def _basic_block_kernel(x_ref, w1_ref, w2_ref, b1_ref, b2_ref, mask_ref,
                        o_ref, stack_ref, *, wp, lblk):
    # x_ref   : (1, C, lblk)  f32, nb lane-concatenated zero-padded images
    # w1_ref  : (Cout, 9*Cin) bf16, conv1 weights (BN1 scale folded), K-packed
    # w2_ref  : (Cout, 9*Cout) bf16, conv2 weights (BN2 scale folded)
    # b1_ref/b2_ref : (Cout, 1) f32 folded BN biases
    # mask_ref: (1, lblk) f32, 1.0 on real image pixels, 0.0 on pad lanes
    # o_ref   : (1, Cout, lblk) f32 padded output (interior lanes are valid)
    # stack_ref: (9*C, lblk) f32 VMEM scratch holding the K-packed im2col stack
    x = x_ref[0]                            # (C, lblk) f32
    c = x.shape[0]
    mask = mask_ref[...]                    # (1, lblk) f32

    # Tap offsets of a 3x3 conv in the flat row-major (width = wp) layout.
    offs = [(dy - 1) * wp + (dx - 1) for dy in range(3) for dx in range(3)]

    def im2col(src):
        # out[p] needs src[p + off_k]; realize each tap as a lane roll and
        # K-pack all 9 taps into rows [k*C:(k+1)*C] of the scratch so each
        # conv is a single MXU dot with K = 9*C.
        for k, off in enumerate(offs):
            shift = (-off) % lblk           # roll(x, s)[p] == x[(p - s) mod L]
            rolled = src if shift == 0 else pltpu.roll(src, shift, 1)
            stack_ref[k * c:(k + 1) * c, :] = rolled
        return stack_ref[...].astype(jnp.bfloat16)

    # conv1 (BN1 scale folded) -> bias -> ReLU, then zero every non-interior
    # lane so conv2's taps read true zero padding (also wipes roll wrap-around
    # garbage, which only lives in pad lanes).
    out1 = jnp.dot(w1_ref[...], im2col(x), preferred_element_type=jnp.float32)
    out1 = jnp.maximum(out1 + b1_ref[...], 0.0) * mask

    # conv2 (BN2 scale folded) -> bias -> +residual -> ReLU.
    out2 = jnp.dot(w2_ref[...], im2col(out1), preferred_element_type=jnp.float32)
    o_ref[0] = jnp.maximum(out2 + b2_ref[...] + x, 0.0)


def basic_block_forward(x_nchw, w1, w2, bn1_scale, bn1_bias, bn2_scale, bn2_bias):
    """x_nchw: (N, C, H, W) f32.  w1/w2: (Cout, Cin, 3, 3) torch layout."""
    N, C, H, W = x_nchw.shape
    Cout = w1.shape[0]
    assert Cout == C, "residual path requires Cin == Cout (no downsample)"

    # Minimal zero-padded canvas; flat length rounded up to a lane multiple.
    Hp, Wp = H + 2, W + 2
    L = ((Hp * Wp + 127) // 128) * 128

    # Batch several images per grid step (lane-concatenated) to amortize the
    # per-step + DMA overhead; for large N the grid grows and stays "parallel"
    # so both v7x TensorCores get work.
    TARGET_LANES_PER_STEP = 4096
    nb = max(1, min(N, TARGET_LANES_PER_STEP // L))
    G = (N + nb - 1) // nb
    Npad = G * nb
    Lblk = nb * L

    x = x_nchw.astype(jnp.float32)
    xpad = jnp.pad(x, ((0, Npad - N), (0, 0), (1, 1), (1, 1)))     # (Npad,C,Hp,Wp)
    xflat = jnp.pad(xpad.reshape(Npad, C, Hp * Wp),
                    ((0, 0), (0, 0), (0, L - Hp * Wp)))            # (Npad,C,L)
    # Lane-concatenate nb images per block: (G, C, nb*L)
    xblk = xflat.reshape(G, nb, C, L).transpose(0, 2, 1, 3).reshape(G, C, Lblk)

    # Fold BN scales into the conv weights, K-pack (Cout,Cin,3,3) ->
    # (Cout, 9*Cin) with column index k*Cin + cin, k = ky*3 + kx, and cast the
    # MXU operands to bf16 (epilogue stays f32).
    w1s = w1.astype(jnp.float32) * bn1_scale.astype(jnp.float32)[:, None, None, None]
    w2s = w2.astype(jnp.float32) * bn2_scale.astype(jnp.float32)[:, None, None, None]
    w1p = jnp.transpose(w1s, (0, 2, 3, 1)).reshape(Cout, 9 * C).astype(jnp.bfloat16)
    w2p = jnp.transpose(w2s, (0, 2, 3, 1)).reshape(Cout, 9 * Cout).astype(jnp.bfloat16)
    b1 = bn1_bias.reshape(Cout, 1).astype(jnp.float32)
    b2 = bn2_bias.reshape(Cout, 1).astype(jnp.float32)

    # Precomputed interior mask (hoisted out of the kernel), tiled over the
    # nb lane-concatenated images.
    idx = jnp.arange(L, dtype=jnp.int32)
    row, col = idx // Wp, idx % Wp
    interior = (row >= 1) & (row <= H) & (col >= 1) & (col <= W)
    mask = jnp.tile(interior.astype(jnp.float32)[None, :], (1, nb))  # (1, Lblk)

    kernel = functools.partial(_basic_block_kernel, wp=Wp, lblk=Lblk)

    out_blk = pl.pallas_call(
        kernel,
        out_shape=jax.ShapeDtypeStruct((G, Cout, Lblk), jnp.float32),
        grid_spec=pltpu.PrefetchScalarGridSpec(
            num_scalar_prefetch=0,
            grid=(G,),
            in_specs=[
                pl.BlockSpec((1, C, Lblk), lambda b: (b, 0, 0)),
                pl.BlockSpec((Cout, 9 * C), lambda b: (0, 0)),
                pl.BlockSpec((Cout, 9 * Cout), lambda b: (0, 0)),
                pl.BlockSpec((Cout, 1), lambda b: (0, 0)),
                pl.BlockSpec((Cout, 1), lambda b: (0, 0)),
                pl.BlockSpec((1, Lblk), lambda b: (0, 0)),
            ],
            out_specs=pl.BlockSpec((1, Cout, Lblk), lambda b: (b, 0, 0)),
            scratch_shapes=[pltpu.VMEM((9 * C, Lblk), jnp.float32)],
        ),
        compiler_params=pltpu.CompilerParams(
            dimension_semantics=("parallel",),
            vmem_limit_bytes=32 * 1024 * 1024),
    )(xblk, w1p, w2p, b1, b2, mask)

    # Undo lane-concatenation, drop trailing pad lanes / pad images, crop the
    # 1-pixel frame -> NCHW.
    out = (out_blk.reshape(G, Cout, nb, L).transpose(0, 2, 1, 3)
           .reshape(Npad, Cout, L))[:N, :, :Hp * Wp]
    return out.reshape(N, Cout, Hp, Wp)[:, :, 1:1 + H, 1:1 + W]


def _reference_forward(x, w1, w2, s1, b1, s2, b2):
    """Pure-JAX f32 NCHW reference (mirrors the PyTorch forward, folded BN)."""
    dn = ("NCHW", "OIHW", "NCHW")
    y = lax.conv_general_dilated(x, w1, (1, 1), "SAME", dimension_numbers=dn)
    y = y * s1[None, :, None, None] + b1[None, :, None, None]
    y = jnp.maximum(y, 0.0)
    z = lax.conv_general_dilated(y, w2, (1, 1), "SAME", dimension_numbers=dn)
    z = z * s2[None, :, None, None] + b2[None, :, None, None]
    return jnp.maximum(z + x, 0.0)


if __name__ == "__main__":
    # BasicBlock(inplanes=4, planes=4, stride=1, downsample=None)
    N, C, H, W = 2, 4, 16, 16
    key = jax.random.PRNGKey(0)
    kx, kw1, kw2, kg1, kb1, kg2, kb2 = jax.random.split(key, 7)

    x = jax.random.normal(kx, (N, C, H, W), dtype=jnp.float32)

    fan_in = C * 3 * 3
    w1 = jax.random.normal(kw1, (C, C, 3, 3), dtype=jnp.float32) / jnp.sqrt(fan_in)
    w2 = jax.random.normal(kw2, (C, C, 3, 3), dtype=jnp.float32) / jnp.sqrt(fan_in)

    # BatchNorm parameters (eval mode: running_mean=0, running_var=1, eps=1e-5)
    eps = 1e-5
    gamma1 = 1.0 + 0.1 * jax.random.normal(kg1, (C,), dtype=jnp.float32)
    beta1 = 0.1 * jax.random.normal(kb1, (C,), dtype=jnp.float32)
    gamma2 = 1.0 + 0.1 * jax.random.normal(kg2, (C,), dtype=jnp.float32)
    beta2 = 0.1 * jax.random.normal(kb2, (C,), dtype=jnp.float32)
    run_mean = jnp.zeros((C,), jnp.float32)
    run_var = jnp.ones((C,), jnp.float32)

    s1 = gamma1 / jnp.sqrt(run_var + eps)
    b1 = beta1 - run_mean * s1
    s2 = gamma2 / jnp.sqrt(run_var + eps)
    b2 = beta2 - run_mean * s2

    out = basic_block_forward(x, w1, w2, s1, b1, s2, b2)
    out = jax.block_until_ready(out)

    ref = _reference_forward(x, w1, w2, s1, b1, s2, b2)
    assert out.shape == (N, C, H, W)
    # Tolerance loosened vs the all-f32 version because the MXU dot operands
    # are bf16 (accumulation and epilogue remain f32).
    assert jnp.allclose(out, ref, atol=1e-1, rtol=1e-1), "mismatch vs JAX reference"

    print("KERNEL_OK")
</pallas_src>

<mosaic_0001>
module attributes {stable_mosaic.version = 11 : i64} {
  func.func @_basic_block_kernel(%arg0: i32, %arg1: memref<1x4x768xf32, #tpu.memory_space<vmem>>, %arg2: memref<4x36xbf16, #tpu.memory_space<vmem>>, %arg3: memref<4x36xbf16, #tpu.memory_space<vmem>>, %arg4: memref<4x1xf32, #tpu.memory_space<vmem>>, %arg5: memref<4x1xf32, #tpu.memory_space<vmem>>, %arg6: memref<1x768xf32, #tpu.memory_space<vmem>>, %arg7: memref<1x4x768xf32, #tpu.memory_space<vmem>>, %arg8: memref<36x768xf32, #tpu.memory_space<vmem>>) attributes {dimension_semantics = [#tpu.dimension_semantics<parallel>], iteration_bounds = array<i64: 1>, scalar_prefetch = 0 : i64, scratch_operands = 1 : i64, tpu.core_type = #tpu.core_type<tc>, window_params = [{transform_indices = @transform_0, window_bounds = array<i64: 1, 4, 768>}, {pipeline_mode = #tpu.pipeline_mode<synchronous>, transform_indices = @transform_1, window_bounds = array<i64: 4, 36>}, {pipeline_mode = #tpu.pipeline_mode<synchronous>, transform_indices = @transform_2, window_bounds = array<i64: 4, 36>}, {pipeline_mode = #tpu.pipeline_mode<synchronous>, transform_indices = @transform_3, window_bounds = array<i64: 4, 1>}, {pipeline_mode = #tpu.pipeline_mode<synchronous>, transform_indices = @transform_4, window_bounds = array<i64: 4, 1>}, {pipeline_mode = #tpu.pipeline_mode<synchronous>, transform_indices = @transform_5, window_bounds = array<i64: 1, 768>}, {transform_indices = @transform_6, window_bounds = array<i64: 1, 4, 768>}]} {
    %c0 = arith.constant 0 : index
    %c0_0 = arith.constant 0 : index
    %c0_1 = arith.constant 0 : index
    %0 = vector.load %arg1[%c0, %c0_0, %c0_1] : memref<1x4x768xf32, #tpu.memory_space<vmem>>, vector<1x4x768xf32>
    %1 = vector.shape_cast %0 : vector<1x4x768xf32> to vector<4x768xf32>
    %c0_2 = arith.constant 0 : index
    %c0_3 = arith.constant 0 : index
    %2 = vector.load %arg6[%c0_2, %c0_3] : memref<1x768xf32, #tpu.memory_space<vmem>>, vector<1x768xf32>
    %c0_4 = arith.constant 0 : index
    %c0_5 = arith.constant 0 : index
    %3 = vector.load %arg2[%c0_4, %c0_5] : memref<4x36xbf16, #tpu.memory_space<vmem>>, vector<4x36xbf16>
    %c19_i32 = arith.constant 19 : i32
    %4 = tpu.dynamic_rotate %1 by %c19_i32 dim 1 : vector<4x768xf32>, i32 -> vector<4x768xf32>
    %c0_6 = arith.constant 0 : index
    %c0_7 = arith.constant 0 : index
    %5 = vector.load %arg8[%c0_6, %c0_7] : memref<36x768xf32, #tpu.memory_space<vmem>>, vector<4x768xf32>
    tpu.vector_store %arg8[%c0_6, %c0_7], %4 {strides = array<i32>} : memref<36x768xf32, #tpu.memory_space<vmem>>, vector<4x768xf32>,
    %c18_i32 = arith.constant 18 : i32
    %6 = tpu.dynamic_rotate %1 by %c18_i32 dim 1 : vector<4x768xf32>, i32 -> vector<4x768xf32>
    %c4 = arith.constant 4 : index
    %c0_8 = arith.constant 0 : index
    %7 = vector.load %arg8[%c4, %c0_8] : memref<36x768xf32, #tpu.memory_space<vmem>>, vector<4x768xf32>
    tpu.vector_store %arg8[%c4, %c0_8], %6 {strides = array<i32>} : memref<36x768xf32, #tpu.memory_space<vmem>>, vector<4x768xf32>,
    %c17_i32 = arith.constant 17 : i32
    %8 = tpu.dynamic_rotate %1 by %c17_i32 dim 1 : vector<4x768xf32>, i32 -> vector<4x768xf32>
    %c8 = arith.constant 8 : index
    %c0_9 = arith.constant 0 : index
    %9 = vector.load %arg8[%c8, %c0_9] : memref<36x768xf32, #tpu.memory_space<vmem>>, vector<4x768xf32>
    tpu.vector_store %arg8[%c8, %c0_9], %8 {strides = array<i32>} : memref<36x768xf32, #tpu.memory_space<vmem>>, vector<4x768xf32>,
    %c1_i32 = arith.constant 1 : i32
    %10 = tpu.dynamic_rotate %1 by %c1_i32 dim 1 : vector<4x768xf32>, i32 -> vector<4x768xf32>
    %c12 = arith.constant 12 : index
    %c0_10 = arith.constant 0 : index
    %11 = vector.load %arg8[%c12, %c0_10] : memref<36x768xf32, #tpu.memory_space<vmem>>, vector<4x768xf32>
    tpu.vector_store %arg8[%c12, %c0_10], %10 {strides = array<i32>} : memref<36x768xf32, #tpu.memory_space<vmem>>, vector<4x768xf32>,
    %c16 = arith.constant 16 : index
    %c0_11 = arith.constant 0 : index
    %12 = vector.load %arg8[%c16, %c0_11] : memref<36x768xf32, #tpu.memory_space<vmem>>, vector<4x768xf32>
    tpu.vector_store %arg8[%c16, %c0_11], %1 {strides = array<i32>} : memref<36x768xf32, #tpu.memory_space<vmem>>, vector<4x768xf32>,
    %c767_i32 = arith.constant 767 : i32
    %13 = tpu.dynamic_rotate %1 by %c767_i32 dim 1 : vector<4x768xf32>, i32 -> vector<4x768xf32>
    %c20 = arith.constant 20 : index
    %c0_12 = arith.constant 0 : index
    %14 = vector.load %arg8[%c20, %c0_12] : memref<36x768xf32, #tpu.memory_space<vmem>>, vector<4x768xf32>
    tpu.vector_store %arg8[%c20, %c0_12], %13 {strides = array<i32>} : memref<36x768xf32, #tpu.memory_space<vmem>>, vector<4x768xf32>,
    %c751_i32 = arith.constant 751 : i32
    %15 = tpu.dynamic_rotate %1 by %c751_i32 dim 1 : vector<4x768xf32>, i32 -> vector<4x768xf32>
    %c24 = arith.constant 24 : index
    %c0_13 = arith.constant 0 : index
    %16 = vector.load %arg8[%c24, %c0_13] : memref<36x768xf32, #tpu.memory_space<vmem>>, vector<4x768xf32>
    tpu.vector_store %arg8[%c24, %c0_13], %15 {strides = array<i32>} : memref<36x768xf32, #tpu.memory_space<vmem>>, vector<4x768xf32>,
    %c750_i32 = arith.constant 750 : i32
    %17 = tpu.dynamic_rotate %1 by %c750_i32 dim 1 : vector<4x768xf32>, i32 -> vector<4x768xf32>
    %c28 = arith.constant 28 : index
    %c0_14 = arith.constant 0 : index
    %18 = vector.load %arg8[%c28, %c0_14] : memref<36x768xf32, #tpu.memory_space<vmem>>, vector<4x768xf32>
    tpu.vector_store %arg8[%c28, %c0_14], %17 {strides = array<i32>} : memref<36x768xf32, #tpu.memory_space<vmem>>, vector<4x768xf32>,
    %c749_i32 = arith.constant 749 : i32
    %19 = tpu.dynamic_rotate %1 by %c749_i32 dim 1 : vector<4x768xf32>, i32 -> vector<4x768xf32>
    %c32 = arith.constant 32 : index
    %c0_15 = arith.constant 0 : index
    %20 = vector.load %arg8[%c32, %c0_15] : memref<36x768xf32, #tpu.memory_space<vmem>>, vector<4x768xf32>
    tpu.vector_store %arg8[%c32, %c0_15], %19 {strides = array<i32>} : memref<36x768xf32, #tpu.memory_space<vmem>>, vector<4x768xf32>,
    %c0_16 = arith.constant 0 : index
    %c0_17 = arith.constant 0 : index
    %21 = vector.load %arg8[%c0_16, %c0_17] : memref<36x768xf32, #tpu.memory_space<vmem>>, vector<36x768xf32>
    %22 = arith.truncf %21 : vector<36x768xf32> to vector<36x768xbf16>
    %cst = arith.constant dense<0.000000e+00> : vector<4x768xf32>
    %23 = tpu.matmul %3, %22, %cst {dimension_numbers = #tpu.dot_dimension_numbers<[1], [0], [0], [1], [0, 0, 1, 1], [], []>} : vector<4x36xbf16>, vector<36x768xbf16>, vector<4x768xf32> -> vector<4x768xf32>
    %c0_18 = arith.constant 0 : index
    %c0_19 = arith.constant 0 : index
    %24 = vector.load %arg4[%c0_18, %c0_19] : memref<4x1xf32, #tpu.memory_space<vmem>>, vector<4x1xf32>
    %25 = vector.broadcast %24 : vector<4x1xf32> to vector<4x768xf32>
    %26 = arith.addf %23, %25 : vector<4x768xf32>
    %cst_20 = arith.constant 0.000000e+00 : f32
    %27 = vector.broadcast %cst_20 : f32 to vector<4x768xf32>
    %28 = arith.maximumf %26, %27 : vector<4x768xf32>
    %29 = vector.broadcast %2 : vector<1x768xf32> to vector<4x768xf32>
    %30 = arith.mulf %28, %29 : vector<4x768xf32>
    %c0_21 = arith.constant 0 : index
    %c0_22 = arith.constant 0 : index
    %31 = vector.load %arg3[%c0_21, %c0_22] : memref<4x36xbf16, #tpu.memory_space<vmem>>, vector<4x36xbf16>
    %c19_i32_23 = arith.constant 19 : i32
    %32 = tpu.dynamic_rotate %30 by %c19_i32_23 dim 1 : vector<4x768xf32>, i32 -> vector<4x768xf32>
    %c0_24 = arith.constant 0 : index
    %c0_25 = arith.constant 0 : index
    %33 = vector.load %arg8[%c0_24, %c0_25] : memref<36x768xf32, #tpu.memory_space<vmem>>, vector<4x768xf32>
    tpu.vector_store %arg8[%c0_24, %c0_25], %32 {strides = array<i32>} : memref<36x768xf32, #tpu.memory_space<vmem>>, vector<4x768xf32>,
    %c18_i32_26 = arith.constant 18 : i32
    %34 = tpu.dynamic_rotate %30 by %c18_i32_26 dim 1 : vector<4x768xf32>, i32 -> vector<4x768xf32>
    %c4_27 = arith.constant 4 : index
    %c0_28 = arith.constant 0 : index
    %35 = vector.load %arg8[%c4_27, %c0_28] : memref<36x768xf32, #tpu.memory_space<vmem>>, vector<4x768xf32>
    tpu.vector_store %arg8[%c4_27, %c0_28], %34 {strides = array<i32>} : memref<36x768xf32, #tpu.memory_space<vmem>>, vector<4x768xf32>,
    %c17_i32_29 = arith.constant 17 : i32
    %36 = tpu.dynamic_rotate %30 by %c17_i32_29 dim 1 : vector<4x768xf32>, i32 -> vector<4x768xf32>
    %c8_30 = arith.constant 8 : index
    %c0_31 = arith.constant 0 : index
    %37 = vector.load %arg8[%c8_30, %c0_31] : memref<36x768xf32, #tpu.memory_space<vmem>>, vector<4x768xf32>
    tpu.vector_store %arg8[%c8_30, %c0_31], %36 {strides = array<i32>} : memref<36x768xf32, #tpu.memory_space<vmem>>, vector<4x768xf32>,
    %c1_i32_32 = arith.constant 1 : i32
    %38 = tpu.dynamic_rotate %30 by %c1_i32_32 dim 1 : vector<4x768xf32>, i32 -> vector<4x768xf32>
    %c12_33 = arith.constant 12 : index
    %c0_34 = arith.constant 0 : index
    %39 = vector.load %arg8[%c12_33, %c0_34] : memref<36x768xf32, #tpu.memory_space<vmem>>, vector<4x768xf32>
    tpu.vector_store %arg8[%c12_33, %c0_34], %38 {strides = array<i32>} : memref<36x768xf32, #tpu.memory_space<vmem>>, vector<4x768xf32>,
    %c16_35 = arith.constant 16 : index
    %c0_36 = arith.constant 0 : index
    %40 = vector.load %arg8[%c16_35, %c0_36] : memref<36x768xf32, #tpu.memory_space<vmem>>, vector<4x768xf32>
    tpu.vector_store %arg8[%c16_35, %c0_36], %30 {strides = array<i32>} : memref<36x768xf32, #tpu.memory_space<vmem>>, vector<4x768xf32>,
    %c767_i32_37 = arith.constant 767 : i32
    %41 = tpu.dynamic_rotate %30 by %c767_i32_37 dim 1 : vector<4x768xf32>, i32 -> vector<4x768xf32>
    %c20_38 = arith.constant 20 : index
    %c0_39 = arith.constant 0 : index
    %42 = vector.load %arg8[%c20_38, %c0_39] : memref<36x768xf32, #tpu.memory_space<vmem>>, vector<4x768xf32>
    tpu.vector_store %arg8[%c20_38, %c0_39], %41 {strides = array<i32>} : memref<36x768xf32, #tpu.memory_space<vmem>>, vector<4x768xf32>,
    %c751_i32_40 = arith.constant 751 : i32
    %43 = tpu.dynamic_rotate %30 by %c751_i32_40 dim 1 : vector<4x768xf32>, i32 -> vector<4x768xf32>
    %c24_41 = arith.constant 24 : index
    %c0_42 = arith.constant 0 : index
    %44 = vector.load %arg8[%c24_41, %c0_42] : memref<36x768xf32, #tpu.memory_space<vmem>>, vector<4x768xf32>
    tpu.vector_store %arg8[%c24_41, %c0_42], %43 {strides = array<i32>} : memref<36x768xf32, #tpu.memory_space<vmem>>, vector<4x768xf32>,
    %c750_i32_43 = arith.constant 750 : i32
    %45 = tpu.dynamic_rotate %30 by %c750_i32_43 dim 1 : vector<4x768xf32>, i32 -> vector<4x768xf32>
    %c28_44 = arith.constant 28 : index
    %c0_45 = arith.constant 0 : index
    %46 = vector.load %arg8[%c28_44, %c0_45] : memref<36x768xf32, #tpu.memory_space<vmem>>, vector<4x768xf32>
    tpu.vector_store %arg8[%c28_44, %c0_45], %45 {strides = array<i32>} : memref<36x768xf32, #tpu.memory_space<vmem>>, vector<4x768xf32>,
    %c749_i32_46 = arith.constant 749 : i32
    %47 = tpu.dynamic_rotate %30 by %c749_i32_46 dim 1 : vector<4x768xf32>, i32 -> vector<4x768xf32>
    %c32_47 = arith.constant 32 : index
    %c0_48 = arith.constant 0 : index
    %48 = vector.load %arg8[%c32_47, %c0_48] : memref<36x768xf32, #tpu.memory_space<vmem>>, vector<4x768xf32>
    tpu.vector_store %arg8[%c32_47, %c0_48], %47 {strides = array<i32>} : memref<36x768xf32, #tpu.memory_space<vmem>>, vector<4x768xf32>,
    %c0_49 = arith.constant 0 : index
    %c0_50 = arith.constant 0 : index
    %49 = vector.load %arg8[%c0_49, %c0_50] : memref<36x768xf32, #tpu.memory_space<vmem>>, vector<36x768xf32>
    %50 = arith.truncf %49 : vector<36x768xf32> to vector<36x768xbf16>
    %cst_51 = arith.constant dense<0.000000e+00> : vector<4x768xf32>
    %51 = tpu.matmul %31, %50, %cst_51 {dimension_numbers = #tpu.dot_dimension_numbers<[1], [0], [0], [1], [0, 0, 1, 1], [], []>} : vector<4x36xbf16>, vector<36x768xbf16>, vector<4x768xf32> -> vector<4x768xf32>
    %c0_52 = arith.constant 0 : index
    %c0_53 = arith.constant 0 : index
    %52 = vector.load %arg5[%c0_52, %c0_53] : memref<4x1xf32, #tpu.memory_space<vmem>>, vector<4x1xf32>
    %53 = vector.broadcast %52 : vector<4x1xf32> to vector<4x768xf32>
    %54 = arith.addf %51, %53 : vector<4x768xf32>
    %55 = arith.addf %54, %1 : vector<4x768xf32>
    %cst_54 = arith.constant 0.000000e+00 : f32
    %56 = vector.broadcast %cst_54 : f32 to vector<4x768xf32>
    %57 = arith.maximumf %55, %56 : vector<4x768xf32>
    %c0_55 = arith.constant 0 : index
    %c0_56 = arith.constant 0 : index
    %c0_57 = arith.constant 0 : index
    %58 = vector.load %arg7[%c0_55, %c0_56, %c0_57] : memref<1x4x768xf32, #tpu.memory_space<vmem>>, vector<1x4x768xf32>
    %59 = vector.shape_cast %58 : vector<1x4x768xf32> to vector<4x768xf32>
    %60 = vector.shape_cast %57 : vector<4x768xf32> to vector<1x4x768xf32>
    tpu.vector_store %arg7[%c0_55, %c0_56, %c0_57], %60 {strides = array<i32>} : memref<1x4x768xf32, #tpu.memory_space<vmem>>, vector<1x4x768xf32>,
    return
  }
  func.func @transform_0(%arg0: i32) -> (i32, i32, i32) {
    %c0_i32 = arith.constant 0 : i32
    %c0_i32_0 = arith.constant 0 : i32
    %c0_i32_1 = arith.constant 0 : i32
    return %arg0, %c0_i32, %c0_i32_0 : i32, i32, i32
  }
  func.func @transform_1(%arg0: i32) -> (i32, i32) {
    %c0_i32 = arith.constant 0 : i32
    %c0_i32_0 = arith.constant 0 : i32
    %c0_i32_1 = arith.constant 0 : i32
    return %c0_i32, %c0_i32_0 : i32, i32
  }
  func.func @transform_2(%arg0: i32) -> (i32, i32) {
    %c0_i32 = arith.constant 0 : i32
    %c0_i32_0 = arith.constant 0 : i32
    %c0_i32_1 = arith.constant 0 : i32
    return %c0_i32, %c0_i32_0 : i32, i32
  }
  func.func @transform_3(%arg0: i32) -> (i32, i32) {
    %c0_i32 = arith.constant 0 : i32
    %c0_i32_0 = arith.constant 0 : i32
    %c0_i32_1 = arith.constant 0 : i32
    return %c0_i32, %c0_i32_0 : i32, i32
  }
  func.func @transform_4(%arg0: i32) -> (i32, i32) {
    %c0_i32 = arith.constant 0 : i32
    %c0_i32_0 = arith.constant 0 : i32
    %c0_i32_1 = arith.constant 0 : i32
    return %c0_i32, %c0_i32_0 : i32, i32
  }
  func.func @transform_5(%arg0: i32) -> (i32, i32) {
    %c0_i32 = arith.constant 0 : i32
    %c0_i32_0 = arith.constant 0 : i32
    %c0_i32_1 = arith.constant 0 : i32
    return %c0_i32, %c0_i32_0 : i32, i32
  }
  func.func @transform_6(%arg0: i32) -> (i32, i32, i32) {
    %c0_i32 = arith.constant 0 : i32
    %c0_i32_0 = arith.constant 0 : i32
    %c0_i32_1 = arith.constant 0 : i32
    return %arg0, %c0_i32, %c0_i32_0 : i32, i32, i32
  }
}

</mosaic_0001>

<bundles_post_ra>
// kernel: tpu_custom_call.1
= control target key start
LH: loop header
LB: loop body
LE: loop exit
PB: predicated region body
PF: predicated region fallthrough
CT: control target
= control target key end

     0   :  { %11 = vsyncpa [#allocation4], 0  ;;  %s1917_s0 = inlined_call_operand.hbm [shape: f32[1,4,768], index: 0, kind: input, shape index: {}]   ;;  %s1918_s1 = inlined_call_operand.vmem [shape: bf16[4,36], index: 1, kind: input, shape index: {}]   ;;  %s1919_s2 = inlined_call_operand.hbm [shape: bf16[4,36], index: 2, kind: input, shape index: {}]   ;;  %s1920_s3 = inlined_call_operand.vmem [shape: f32[4,1], index: 3, kind: input, shape index: {}]   ;;  %s1921_s4 = inlined_call_operand.vmem [shape: f32[4,1], index: 4, kind: input, shape index: {}]   ;;  %s1922_s5 = inlined_call_operand.vmem [shape: f32[1,768], index: 5, kind: input, shape index: {}]   ;;  %s1923_s6 = inlined_call_operand.hbm [shape: f32[1,4,768], index: 6, kind: output, shape index: {}]  }
   0x1   :  { %12 = vsyncpa [#allocation7], 0 }
   0x2   :  { %13 = vsyncpa [#allocation5], 0  ;;  %s19_s23 = sshll.u32 %s1917_s0, 4  ;;  %s1268_s24 = smov [#allocation3]   ;;  %s20_s23 = int_to_ptr.hbm [resolvable:$true] %s19_s23 }
   0x3   :  { %s21_s25 = sshll.u32 %s1268_s24, 4  ;;  %s32_s28 = sshll.u32 %s1919_s2, 4  ;;  %s22_s25 = int_to_ptr.vmem [resolvable:$true] %s21_s25  ;;  %s33_s28 = int_to_ptr.hbm [resolvable:$true] %s32_s28 }
   0x4   :  { %24 = dma.hbm_to_vmem [thread:$0]  %s20_s23, 384, %s22_s25, [#allocation4]  }
   0x5   :  { %s1269_s29 = smov [#allocation6]  }
   0x6   :  { %s34_s30 = sshll.u32 %s1269_s29, 4  ;;  %s35_s30 = int_to_ptr.vmem [resolvable:$true] %s34_s30 }
   0x7   :  { %37 = dma.hbm_to_vmem [thread:$0]  %s33_s28, 32, %s35_s30, [#allocation7]  }
   0x8   :  { %1262 = dma.done.wait [#allocation4], 384  }
   0x9   :  { %1263 = vsyncadd [#allocation4], 4294966912 }
   0xa   :  { %1264 = dma.done.wait [#allocation7], 32  }
   0xb   :  { %1265 = vsyncadd [#allocation7], 4294967264  ;;  %v1321_v0 = vld [vmem:[#allocation3] sm:$0xff]  ;;  %v1323_v1 = vld [vmem:[#allocation3 + $0x8] sm:$0xff]  ;;  %s1270_s0 = smov 19   ;;  %s1271_s2 = smov 18   ;;  %v90_v58 = vlaneseq }
   0xc   :  { %v1325_v2 = vld [vmem:[#allocation3 + $0x10] sm:$0xff]  ;;  %61 = vst [vmem:[#allocation1] ss:$2 sm:$0xff] %v1321_v0  ;;  %s1272_s7 = smov 17   ;;  %s1273_s8 = smov 1   ;;  %vm552_vm8 = vcmask 1041408  }
   0xd   :  { %63 = vst [vmem:[#allocation1 + $0x10] ss:$2 sm:$0xff] %v1323_v1  ;;  %s1274_s9 = smov 127   ;;  %s1275_s10 = smov 111   ;;  %v1426_v60 = vand.u32 127, %v90_v58  ;;  %vm548_vm9 = vcmask 293888  }
   0xe   :  { %65 = vst [vmem:[#allocation1 + $0x20] ss:$2 sm:$0xff] %v1325_v2  ;;  %s1276_s11 = smov 110   ;;  %s1277_s12 = smov 109   ;;  %vm1136_vm10 = vcmask 1043456  }
   0xf   :  { %vm92_vm0 = vcmp.lt.s32.totalorder %v1426_v60, 19  ;;  %vm134_vm1 = vcmp.lt.s32.totalorder %v1426_v60, 18  ;;  %vm194_vm2 = vcmp.lt.s32.totalorder %v1426_v60, 17  ;;  %vm236_vm3 = vcmp.lt.s32.totalorder %v1426_v60, 1  ;;  %s1153_s21 = sshll.u32 %s1923_s6, 4  ;;  %s1154_s21 = int_to_ptr.hbm [resolvable:$true] %s1153_s21 }
  0x10   :  { %vm319_vm4 = vcmp.lt.s32.totalorder %v1426_v60, 127  ;;  %vm421_vm5 = vcmp.lt.s32.totalorder %v1426_v60, 110  ;;  %vm379_vm6 = vcmp.lt.s32.totalorder %v1426_v60, 111  ;;  %vm481_vm7 = vcmp.lt.s32.totalorder %v1426_v60, 109 }
  0x13   :  { %v67_v3 = vld.sshfl [vmem:[#allocation1 + $0x8] sm:$0xff pattern:$0x75316420]  ;;  %v66_v4 = vld.sshfl [vmem:[#allocation1] sm:$0xff pattern:$0x75316420] }
  0x14   :  { %80 = vrot.lane.b32.xlu1 %v67_v3, %s1270_s0  ;;  %78 = vrot.lane.b32.xlu0 %v66_v4, %s1270_s0  ;;  %105 = vst [vmem:[#allocation1] ss:$2 sm:$0xff] %v1321_v0  ;;  %v68_v5 = vld.sshfl [vmem:[#allocation1 + $0x10] sm:$0xff pattern:$0x75316420] }
  0x15   :  { %v1333_v6 = vld.sshfl [vmem:[#allocation1 + $0x18] sm:$0xff pattern:$0x75316420]  ;;  %82 = vrot.lane.b32.xlu2 %v68_v5, %s1270_s0  ;;  %v1336_v7 = vld.sshfl [vmem:[#allocation1 + $0x20] sm:$0xff pattern:$0x75316420] }
  0x16   :  { %107 = vst [vmem:[#allocation1 + $0x10] ss:$2 sm:$0xff] %v1323_v1  ;;  %v1339_v8 = vld.sshfl [vmem:[#allocation1 + $0x28] sm:$0xff pattern:$0x75316420] }
  0x17   :  { %109 = vst [vmem:[#allocation1 + $0x20] ss:$2 sm:$0xff] %v1325_v2 }
  0x1b   :  { %v111_v9 = vld.sshfl [vmem:[#allocation1 + $0x8] sm:$0xff pattern:$0x75316420]  ;;  %v110_v10 = vld.sshfl [vmem:[#allocation1] sm:$0xff pattern:$0x75316420] }
  0x1c   :  { %124 = vrot.lane.b32.xlu1 %v111_v9, %s1271_s2  ;;  %122 = vrot.lane.b32.xlu0 %v110_v10, %s1271_s2  ;;  %165 = vst [vmem:[#allocation1] ss:$2 sm:$0xff] %v1321_v0 }
  0x1d   :  { %v112_v11 = vld.sshfl [vmem:[#allocation1 + $0x10] sm:$0xff pattern:$0x75316420]  ;;  %v1345_v12 = vld.sshfl [vmem:[#allocation1 + $0x18] sm:$0xff pattern:$0x75316420] }
  0x1e   :  { %167 = vst [vmem:[#allocation1 + $0x10] ss:$2 sm:$0xff] %v1323_v1  ;;  %v1348_v13 = vld.sshfl [vmem:[#allocation1 + $0x20] sm:$0xff pattern:$0x75316420] }
  0x1f   :  { %v115_v14 = vld.sshfl [vmem:[#allocation1 + $0x28] sm:$0xff pattern:$0x75316420] }
  0x20   :  { %169 = vst [vmem:[#allocation1 + $0x20] ss:$2 sm:$0xff] %v1325_v2 }
  0x23   :  { %v171_v15 = vld.sshfl [vmem:[#allocation1 + $0x8] sm:$0xff pattern:$0x75316420]  ;;  %v170_v16 = vld.sshfl [vmem:[#allocation1] sm:$0xff pattern:$0x75316420] }
  0x24   :  { %126 = vrot.lane.b32.xlu1 %v112_v11, %s1271_s2  ;;  %184 = vrot.lane.b32.xlu0 %v171_v15, %s1272_s7  ;;  %207 = vst [vmem:[#allocation1] ss:$2 sm:$0xff] %v1321_v0 }
  0x25   :  { %182 = vrot.lane.b32.xlu2 %v170_v16, %s1272_s7  ;;  %v172_v17 = vld.sshfl [vmem:[#allocation1 + $0x10] sm:$0xff pattern:$0x75316420]  ;;  %v1355_v18 = vld.sshfl [vmem:[#allocation1 + $0x18] sm:$0xff pattern:$0x75316420] }
  0x26   :  { %209 = vst [vmem:[#allocation1 + $0x10] ss:$2 sm:$0xff] %v1323_v1 }
  0x27   :  { %v1358_v19 = vld.sshfl [vmem:[#allocation1 + $0x20] sm:$0xff pattern:$0x75316420]  ;;  %v1360_v20 = vld.sshfl [vmem:[#allocation1 + $0x28] sm:$0xff pattern:$0x75316420] }
  0x28   :  { %211 = vst [vmem:[#allocation1 + $0x20] ss:$2 sm:$0xff] %v1325_v2 }
  0x2b   :  { %v212_v21 = vld.sshfl [vmem:[#allocation1] sm:$0xff pattern:$0x75316420]  ;;  %v213_v22 = vld.sshfl [vmem:[#allocation1 + $0x8] sm:$0xff pattern:$0x75316420] }
  0x2c   :  { %132 = vrot.lane.b32.xlu1 %v115_v14, %s1271_s2  ;;  %186 = vrot.lane.b32.xlu0 %v172_v17, %s1272_s7  ;;  %267 = vst [vmem:[#allocation1] ss:$2 sm:$0xff] %v1321_v0 }
  0x2d   :  { %v1366_v23 = vld.sshfl [vmem:[#allocation1 + $0x18] sm:$0xff pattern:$0x75316420]  ;;  %224 = vrot.lane.b32.xlu2 %v212_v21, %s1273_s8  ;;  %v214_v24 = vld.sshfl [vmem:[#allocation1 + $0x10] sm:$0xff pattern:$0x75316420] }
  0x2e   :  { %269 = vst [vmem:[#allocation1 + $0x10] ss:$2 sm:$0xff] %v1323_v1 }
  0x2f   :  { %v1370_v25 = vld.sshfl [vmem:[#allocation1 + $0x20] sm:$0xff pattern:$0x75316420]  ;;  %v217_v26 = vld.sshfl [vmem:[#allocation1 + $0x28] sm:$0xff pattern:$0x75316420] }
  0x30   :  { %271 = vst [vmem:[#allocation1 + $0x20] ss:$2 sm:$0xff] %v1325_v2 }
  0x33   :  { %v272_v27 = vld.sshfl [vmem:[#allocation1] sm:$0xff pattern:$0x75316420]  ;;  %v273_v28 = vld.sshfl [vmem:[#allocation1 + $0x8] sm:$0xff pattern:$0x75316420] }
  0x34   :  { %226 = vrot.lane.b32.xlu0 %v213_v22, %s1273_s8  ;;  %284 = vst [vmem:[#allocation2 + $0x60] sm:$0xf] %v272_v27 }
  0x35   :  { %285 = vst [vmem:[#allocation2 + $0xa8] sm:$0xf] %v273_v28  ;;  %v274_v29 = vld.sshfl [vmem:[#allocation1 + $0x10] sm:$0xff pattern:$0x75316420]  ;;  %228 = vrot.lane.b32.xlu2 %v214_v24, %s1273_s8 }
  0x36   :  { %290 = vst [vmem:[#allocation1] ss:$2 sm:$0xff] %v1321_v0  ;;  %v275_v30 = vld.sshfl [vmem:[#allocation1 + $0x18] sm:$0xff pattern:$0x75316420] }
  0x37   :  { %286 = vst [vmem:[#allocation2 + $0x70] sm:$0xf] %v274_v29  ;;  %v276_v31 = vld.sshfl [vmem:[#allocation1 + $0x20] sm:$0xff pattern:$0x75316420] }
  0x38   :  { %287 = vst [vmem:[#allocation2 + $0x40] sm:$0xf] %v275_v30  ;;  %v277_v32 = vld.sshfl [vmem:[#allocation1 + $0x28] sm:$0xff pattern:$0x75316420] }
  0x39   :  { %292 = vst [vmem:[#allocation1 + $0x10] ss:$2 sm:$0xff] %v1323_v1 }
  0x3a   :  { %294 = vst [vmem:[#allocation1 + $0x20] ss:$2 sm:$0xff] %v1325_v2 }
  0x3b   :  { %288 = vst [vmem:[#allocation2 + $0x8] sm:$0xf] %v276_v31 }
  0x3c   :  { %289 = vst [vmem:[#allocation2 + $0x78] sm:$0xf] %v277_v32 }
  0x3d   :  { %234 = vrot.lane.b32.xlu2 %v217_v26, %s1273_s8  ;;  %v296_v33 = vld.sshfl [vmem:[#allocation1 + $0x8] sm:$0xff pattern:$0x75316420]  ;;  %v295_v34 = vld.sshfl [vmem:[#allocation1] sm:$0xff pattern:$0x75316420] }
  0x3e   :  { %309 = vrot.lane.b32.xlu1 %v296_v33, %s1274_s9  ;;  %350 = vst [vmem:[#allocation1] ss:$2 sm:$0xff] %v1321_v0 }
  0x40   :  { %v297_v35 = vld.sshfl [vmem:[#allocation1 + $0x10] sm:$0xff pattern:$0x75316420]  ;;  %v298_v36 = vld.sshfl [vmem:[#allocation1 + $0x18] sm:$0xff pattern:$0x75316420] }
  0x41   :  { %v299_v37 = vld.sshfl [vmem:[#allocation1 + $0x20] sm:$0xff pattern:$0x75316420]  ;;  %v300_v38 = vld.sshfl [vmem:[#allocation1 + $0x28] sm:$0xff pattern:$0x75316420] }
  0x42   :  { %354 = vst [vmem:[#allocation1 + $0x20] ss:$2 sm:$0xff] %v1325_v2 }
  0x43   :  { %352 = vst [vmem:[#allocation1 + $0x10] ss:$2 sm:$0xff] %v1323_v1 }
  0x45   :  { %311 = vrot.lane.b32.xlu2 %v297_v35, %s1274_s9  ;;  %v356_v39 = vld.sshfl [vmem:[#allocation1 + $0x8] sm:$0xff pattern:$0x75316420]  ;;  %v355_v40 = vld.sshfl [vmem:[#allocation1] sm:$0xff pattern:$0x75316420] }
  0x46   :  { %313 = vrot.lane.b32.xlu1 %v298_v36, %s1274_s9  ;;  %369 = vrot.lane.b32.xlu0 %v356_v39, %s1275_s10  ;;  %392 = vst [vmem:[#allocation1] ss:$2 sm:$0xff] %v1321_v0 }
  0x49   :  { %v1387_v41 = vld.sshfl [vmem:[#allocation1 + $0x20] sm:$0xff pattern:$0x75316420]  ;;  %v360_v42 = vld.sshfl [vmem:[#allocation1 + $0x28] sm:$0xff pattern:$0x75316420] }
  0x4a   :  { %396 = vst [vmem:[#allocation1 + $0x20] ss:$2 sm:$0xff] %v1325_v2  ;;  %v358_v43 = vld.sshfl [vmem:[#allocation1 + $0x18] sm:$0xff pattern:$0x75316420] }
  0x4b   :  { %v357_v44 = vld.sshfl [vmem:[#allocation1 + $0x10] sm:$0xff pattern:$0x75316420] }
  0x4c   :  { %394 = vst [vmem:[#allocation1 + $0x10] ss:$2 sm:$0xff] %v1323_v1 }
  0x4d   :  { %373 = vrot.lane.b32.xlu2 %v358_v43, %s1275_s10  ;;  %v397_v45 = vld.sshfl [vmem:[#allocation1] sm:$0xff pattern:$0x75316420]  ;;  %v398_v46 = vld.sshfl [vmem:[#allocation1 + $0x8] sm:$0xff pattern:$0x75316420] }
  0x4e   :  { %307 = vrot.lane.b32.xlu1 %v295_v34, %s1274_s9  ;;  %367 = vrot.lane.b32.xlu0 %v355_v40, %s1275_s10  ;;  %452 = vst [vmem:[#allocation1] ss:$2 sm:$0xff] %v1321_v0 }
  0x51   :  { %v401_v47 = vld.sshfl [vmem:[#allocation1 + $0x20] sm:$0xff pattern:$0x75316420]  ;;  %v402_v48 = vld.sshfl [vmem:[#allocation1 + $0x28] sm:$0xff pattern:$0x75316420] }
  0x52   :  { %456 = vst [vmem:[#allocation1 + $0x20] ss:$2 sm:$0xff] %v1325_v2 }
  0x53   :  { %v399_v49 = vld.sshfl [vmem:[#allocation1 + $0x10] sm:$0xff pattern:$0x75316420]  ;;  %v400_v50 = vld.sshfl [vmem:[#allocation1 + $0x18] sm:$0xff pattern:$0x75316420] }
  0x54   :  { %454 = vst [vmem:[#allocation1 + $0x10] ss:$2 sm:$0xff] %v1323_v1 }
  0x55   :  { %411 = vrot.lane.b32.xlu2 %v398_v46, %s1276_s11  ;;  %v458_v51 = vld.sshfl [vmem:[#allocation1 + $0x8] sm:$0xff pattern:$0x75316420]  ;;  %v457_v52 = vld.sshfl [vmem:[#allocation1] sm:$0xff pattern:$0x75316420] }
  0x56   :  { %371 = vrot.lane.b32.xlu1 %v357_v44, %s1275_s10  ;;  %413 = vrot.lane.b32.xlu0 %v399_v49, %s1276_s11  ;;  %1098 = vst [vmem:[#allocation1] ss:$2 sm:$0xff] %v1321_v0 }
  0x59   :  { %v462_v53 = vld.sshfl [vmem:[#allocation1 + $0x28] sm:$0xff pattern:$0x75316420]  ;;  %v461_v54 = vld.sshfl [vmem:[#allocation1 + $0x20] sm:$0xff pattern:$0x75316420] }
  0x5a   :  { %1102 = vst [vmem:[#allocation1 + $0x20] ss:$2 sm:$0xff] %v1325_v2 }
  0x5b   :  { %v460_v55 = vld.sshfl [vmem:[#allocation1 + $0x18] sm:$0xff pattern:$0x75316420]  ;;  %v459_v56 = vld.sshfl [vmem:[#allocation1 + $0x10] sm:$0xff pattern:$0x75316420] }
  0x5c   :  { %1100 = vst [vmem:[#allocation1 + $0x10] ss:$2 sm:$0xff] %v1323_v1 }
  0x5d   :  { %415 = vrot.lane.b32.xlu2 %v400_v50, %s1276_s11 }
  0x5e   :  { %88 = vrot.lane.b32.xlu1 %v1339_v8, %s1270_s0  ;;  %471 = vrot.lane.b32.xlu0 %v458_v51, %s1277_s12 }
  0x65   :  { %409 = vrot.lane.b32.xlu2 %v397_v45, %s1276_s11 }
  0x66   :  { %475 = vrot.lane.b32.xlu1 %v460_v55, %s1277_s12  ;;  %473 = vrot.lane.b32.xlu0 %v459_v56, %s1277_s12 }
  0x6d   :  { %192 = vrot.lane.b32.xlu2 %v1360_v20, %s1272_s7 }
  0x6e   :  { %479 = vrot.lane.b32.xlu0 %v462_v53, %s1277_s12  ;;  %469 = vrot.lane.b32.xlu1 %v457_v52, %s1277_s12 }
  0x6f   :  { %v1415_v57 = vpop.permute.xlu2 %82 }
  0x75   :  { %377 = vrot.lane.b32.xlu2 %v360_v42, %s1275_s10 }
  0x76   :  { %317 = vrot.lane.b32.xlu0 %v300_v38, %s1274_s9  ;;  %419 = vrot.lane.b32.xlu1 %v402_v48, %s1276_s11 }
  0x7d   :  { %477 = vrot.lane.b32.xlu2 %v461_v54, %s1277_s12 }
  0x7e   :  { %130 = vrot.lane.b32.xlu0 %v1348_v13, %s1271_s2  ;;  %232 = vrot.lane.b32.xlu1 %v1370_v25, %s1273_s8 }
  0x7f   :  { %v1424_v59 = vpop.permute.xlu2 %182 }
  0x85   :  { %315 = vrot.lane.b32.xlu2 %v299_v37, %s1274_s9 }
  0x86   :  { %86 = vrot.lane.b32.xlu0 %v1336_v7, %s1270_s0  ;;  %190 = vrot.lane.b32.xlu1 %v1358_v19, %s1272_s7  ;;  %v81_v61 = vpop.permute.xlu1 %80  ;;  %v1434_v62 = vpop.permute.xlu0 %78 }
  0x87   :  { %v96_v63 = vsel %vm92_vm0, %v81_v61, %v1415_v57  ;;  %v97_v0 = vsel %vm92_vm0, %v1434_v62, %v81_v61  ;;  %v225_v1 = vpop.permute.xlu2 %224 }
  0x88   :  { %101 = vst [vmem:[#allocation2 + $0xd8] sm:$0xf] %v96_v63 }
  0x89   :  { %100 = vst [vmem:[#allocation2] sm:$0xf] %v97_v0 }
  0x8d   :  { %128 = vrot.lane.b32.xlu2 %v1345_v12, %s1271_s2 }
  0x8e   :  { %417 = vrot.lane.b32.xlu0 %v401_v47, %s1276_s11  ;;  %375 = vrot.lane.b32.xlu1 %v1387_v41, %s1275_s10  ;;  %v125_v2 = vpop.permute.xlu1 %124  ;;  %v123_v3 = vpop.permute.xlu0 %122 }
  0x8f   :  { %v139_v4 = vsel %vm134_vm1, %v123_v3, %v125_v2  ;;  %v1450_v5 = vpop.permute.xlu2 %228 }
  0x90   :  { %v148_v7 = vrot.slane %v139_v4, 4  ;;  %v1278_v4 = vmov 0  }
  0x91   :  { %1188 = vset.pattern.permute.xlu0 %v1278_v4  ;;  %1189 = vset.pattern.permute.xlu2 %v1278_v4 }
  0x92   :  { %160 = vst [vmem:[#allocation2] sm:$0xf0] %v148_v7 }
  0x95   :  { %188 = vrot.lane.b32.xlu2 %v1355_v18, %s1272_s7 }
  0x96   :  { %230 = vrot.lane.b32.xlu0 %v1366_v23, %s1273_s8  ;;  %84 = vrot.lane.b32.xlu1 %v1333_v6, %s1270_s0  ;;  %v1460_v8 = vpop.permute.xlu1 %126  ;;  %v185_v9 = vpop.permute.xlu0 %184 }
  0x97   :  { %v138_v10 = vsel %vm134_vm1, %v125_v2, %v1460_v8  ;;  %v199_v11 = vsel %vm194_vm2, %v1424_v59, %v185_v9  ;;  %v1468_v12 = vpop.permute.xlu2 %234 }
  0x98   :  { %v149_v13 = vrot.slane %v138_v10, 4  ;;  %202 = vst [vmem:[#allocation2 + $0x48] sm:$0xf] %v199_v11  ;;  %v242_v14 = vsel %vm236_vm3, %v1468_v12, %v225_v1 }
  0x99   :  { %v249_v6 = vrot.slane %v242_v14, 4 }
  0x9a   :  { %161 = vst [vmem:[#allocation2 + $0xd8] sm:$0xf0] %v149_v13 }
  0x9b   :  { %261 = vst [vmem:[#allocation2 + $0x30] sm:$0xf0] %v249_v6 }
  0x9e   :  { %v1473_v15 = vpop.permute.xlu1 %132  ;;  %v1475_v16 = vpop.permute.xlu0 %186 }
  0x9f   :  { %v140_v17 = vsel %vm134_vm1, %v1473_v15, %v123_v3  ;;  %v198_v18 = vsel %vm194_vm2, %v185_v9, %v1475_v16  ;;  %v312_v19 = vpop.permute.xlu2 %311 }
  0xa0   :  { %v147_v20 = vrot.slane %v140_v17, 4  ;;  %203 = vst [vmem:[#allocation2 + $0x80] sm:$0xf] %v198_v18 }
  0xa2   :  { %159 = vst [vmem:[#allocation2 + $0xb0] sm:$0xf0] %v147_v20 }
  0xa6   :  { %v227_v21 = vpop.permute.xlu0 %226 }
  0xa7   :  { %v240_v22 = vsel %vm236_vm3, %v227_v21, %v1450_v5  ;;  %v241_v23 = vsel %vm236_vm3, %v225_v1, %v227_v21  ;;  %v1488_v24 = vpop.permute.xlu2 %373 }
  0xa8   :  { %v250_v25 = vrot.slane %v241_v23, 4  ;;  %v251_v26 = vrot.slane %v240_v22, 4 }
  0xaa   :  { %262 = vst [vmem:[#allocation2 + $0x48] sm:$0xf0] %v250_v25 }
  0xab   :  { %263 = vst [vmem:[#allocation2 + $0x80] sm:$0xf0] %v251_v26 }
  0xaf   :  { %v412_v27 = vpop.permute.xlu2 %411 }
  0xb0   :  { %v310_v28 = vpop.permute.xlu1 %309 }
  0xb1   :  { %v323_v29 = vsel %vm319_vm4, %v310_v28, %v312_v19 }
  0xb2   :  { %v333_v30 = vrot.slane %v323_v29, 4 }
  0xb4   :  { %345 = vst [vmem:[#allocation2 + $0xa8] sm:$0xf0] %v333_v30 }
  0xb7   :  { %v1493_v31 = vpop.permute.xlu2 %415 }
  0xb8   :  { %v314_v32 = vpop.permute.xlu1 %313  ;;  %v370_v33 = vpop.permute.xlu0 %369 }
  0xb9   :  { %v322_v34 = vsel %vm319_vm4, %v312_v19, %v314_v32 }
  0xba   :  { %v334_v35 = vrot.slane %v322_v34, 4 }
  0xbc   :  { %346 = vst [vmem:[#allocation2 + $0x70] sm:$0xf0] %v334_v35 }
  0xbf   :  { %v1499_v36 = vpop.permute.xlu2 %409 }
  0xc0   :  { %v1501_v37 = vpop.permute.xlu1 %307  ;;  %v368_v38 = vpop.permute.xlu0 %367  ;;  %v426_v39 = vsel %vm421_vm5, %v1499_v36, %v412_v27 }
  0xc1   :  { %v324_v40 = vsel %vm319_vm4, %v1501_v37, %v310_v28  ;;  %v384_v41 = vsel %vm379_vm6, %v368_v38, %v370_v33  ;;  %v434_v42 = vrot.slane %v426_v39, 4 }
  0xc2   :  { %v332_v43 = vrot.slane %v324_v40, 4  ;;  %386 = vst [vmem:[#allocation2 + $0xc0] sm:$0xf] %v384_v41 }
  0xc3   :  { %446 = vst [vmem:[#allocation2 + $0xc0] sm:$0xf0] %v434_v42 }
  0xc4   :  { %344 = vst [vmem:[#allocation2 + $0x60] sm:$0xf0] %v332_v43 }
  0xc7   :  { %v1511_v44 = vpop.permute.xlu2 %192 }
  0xc8   :  { %v372_v45 = vpop.permute.xlu1 %371  ;;  %v414_v46 = vpop.permute.xlu0 %413  ;;  %v200_v47 = vsel %vm194_vm2, %v1511_v44, %v1424_v59 }
  0xc9   :  { %v382_v48 = vsel %vm379_vm6, %v372_v45, %v1488_v24  ;;  %v383_v49 = vsel %vm379_vm6, %v370_v33, %v372_v45  ;;  %v424_v50 = vsel %vm421_vm5, %v414_v46, %v1493_v31  ;;  %v425_v51 = vsel %vm421_vm5, %v412_v27, %v414_v46  ;;  %201 = vst [vmem:[#allocation2 + $0x30] sm:$0xf] %v200_v47  ;;  %v508_v33 = vld [vmem:[#allocation2 + $0x70] sm:$0xff]  ;;  %v501_v46 = vld [vmem:[#allocation2 + $0x48] sm:$0xff] }
  0xca   :  { %387 = vst [vmem:[#allocation2 + $0x10] sm:$0xf] %v383_v49  ;;  %v435_v52 = vrot.slane %v425_v51, 4  ;;  %v436_v53 = vrot.slane %v424_v50, 4  ;;  %v502_v49 = vld [vmem:[#allocation2 + $0x80] sm:$0xff] }
  0xcb   :  { %388 = vst [vmem:[#allocation2 + $0x38] sm:$0xf] %v382_v48  ;;  %v495_v51 = vld [vmem:[#allocation2] sm:$0xff] }
  0xcc   :  { %447 = vst [vmem:[#allocation2 + $0x10] sm:$0xf0] %v435_v52 }
  0xcd   :  { %448 = vst [vmem:[#allocation2 + $0x38] sm:$0xf0] %v436_v53  ;;  %v525_v53 = vpack.c.bf16 %v501_v46, %v495_v51 }
  0xcf   :  { %v1527_v54 = vpop.permute.xlu2 %377 }
  0xd0   :  { %v1529_v55 = vpop.permute.xlu1 %88  ;;  %v385_v56 = vsel %vm379_vm6, %v1527_v54, %v368_v38  ;;  %v472_v58 = vpop.permute.xlu0 %471 }
  0xd1   :  { %v98_v59 = vsel %vm92_vm0, %v1529_v55, %v1434_v62  ;;  %391 = vst [vmem:[#allocation2 + $0xa0] sm:$0xf] %v385_v56  ;;  %v542_v62 = vld [vmem:[%s1920_s3] sm:$0xf] }
  0xd2   :  { %99 = vst [vmem:[#allocation2 + $0xb0] sm:$0xf] %v98_v59  ;;  %545 = vperm.xlu0 %1188, %v542_v62   ;;  %v496_v56 = vld [vmem:[#allocation2 + $0xd8] sm:$0xff] }
  0xd3   :  { %v513_v27 = vld [vmem:[#allocation2 + $0x10] sm:$0xff] }
  0xd4   :  { %v514_v28 = vld [vmem:[#allocation2 + $0x38] sm:$0xff] }
  0xd5   :  { %v532_v40 = vpack.c.bf16 %v514_v28, %v508_v33 }
  0xd7   :  { %v478_v61 = vpop.permute.xlu2 %477 }
  0xd8   :  { %v476_v63 = vpop.permute.xlu1 %475  ;;  %v474_v0 = vpop.permute.xlu0 %473 }
  0xd9   :  { %v483_v1 = vsel %vm481_vm7, %v476_v63, %v478_v61  ;;  %v484_v2 = vsel %vm481_vm7, %v474_v0, %v476_v63  ;;  %v485_v3 = vsel %vm481_vm7, %v472_v58, %v474_v0 }
  0xda   :  { %491 = vst [vmem:[#allocation2 + $0xc8] sm:$0xf] %v483_v1  ;;  %v1577_v1 = vld [vmem:[%s1918_s1] sm:$0x3] }
  0xdb   :  { %489 = vst [vmem:[#allocation2 + $0xd0] sm:$0xf] %v485_v3 }
  0xdc   :  { %490 = vst [vmem:[#allocation2 + $0x98] sm:$0xf] %v484_v2 }
  0xdf   :  { %v316_v7 = vpop.permute.xlu2 %315 }
  0xe0   :  { %v321_v9 = vsel %vm319_vm4, %v314_v32, %v316_v7  ;;  %v480_v10 = vpop.permute.xlu0 %479  ;;  %v470_v11 = vpop.permute.xlu1 %469  ;;  %v507_v32 = vld [vmem:[#allocation2 + $0xa8] sm:$0xff] }
  0xe1   :  { %v335_v13 = vrot.slane %v321_v9, 4  ;;  %v482_v14 = vsel %vm481_vm7, %v478_v61, %v480_v10  ;;  %v486_v6 = vsel %vm481_vm7, %v470_v11, %v472_v58  ;;  %v521_v17 = vld [vmem:[#allocation2 + $0xc8] sm:$0xf]  ;;  %v487_v18 = vsel %vm481_vm7, %v480_v10, %v470_v11  ;;  %v506_v61 = vld [vmem:[#allocation2 + $0x60] sm:$0xff] }
  0xe2   :  { %492 = vst [vmem:[#allocation2 + $0xe0] sm:$0xf] %v482_v14  ;;  %v519_v19 = vld [vmem:[#allocation2 + $0xd0] sm:$0xf]  ;;  %v539_v20 = vpack.c.bf16 %v521_v17, %v521_v17  ;;  %v531_v39 = vpack.c.bf16 %v513_v27, %v507_v32  ;;  %v526_v58 = vpack.c.bf16 %v502_v49, %v496_v56 }
  0xe3   :  { %347 = vst [vmem:[#allocation2 + $0x40] sm:$0xf0] %v335_v13  ;;  %v537_v21 = vpack.c.bf16 %v519_v19, %v519_v19  ;;  %v520_v22 = vld [vmem:[#allocation2 + $0x98] sm:$0xf]  ;;  %v500_v19 = vld [vmem:[#allocation2 + $0x30] sm:$0xff] }
  0xe4   :  { %488 = vst [vmem:[#allocation2 + $0x58] sm:$0xf] %v486_v6  ;;  %v538_v23 = vpack.c.bf16 %v520_v22, %v520_v22  ;;  %v563_v25 = vsel %vm552_vm8, %v539_v20, 0 }
  0xe5   :  { %493 = vst [vmem:[#allocation2 + $0x20] sm:$0xf] %v487_v18  ;;  %v557_v26 = vsel %vm552_vm8, %v537_v21, 0  ;;  %615 = vmatpush.bf16.msra.mxu3 %v563_v25  ;;  %v494_v18 = vld [vmem:[#allocation2 + $0xb0] sm:$0xff] }
  0xe6   :  { %589 = vmatpush.bf16.msra.mxu1 %v557_v26  ;;  %v560_v29 = vsel %vm552_vm8, %v538_v23, 0 }
  0xe7   :  { %602 = vmatpush.bf16.msra.mxu2 %v560_v29  ;;  %v129_v30 = vpop.permute.xlu2 %128 }
  0xe8   :  { %v137_v34 = vsel %vm134_vm1, %v1460_v8, %v129_v30  ;;  %v318_v35 = vpop.permute.xlu0 %317  ;;  %v1562_v38 = vpop.permute.xlu1 %419 }
  0xe9   :  { %v150_v41 = vrot.slane %v137_v34, 4  ;;  %v320_v42 = vsel %vm319_vm4, %v316_v7, %v318_v35  ;;  %v325_v43 = vsel %vm319_vm4, %v318_v35, %v1501_v37  ;;  %v427_v45 = vsel %vm421_vm5, %v1562_v38, %v1499_v36  ;;  %v512_v36 = vld [vmem:[#allocation2 + $0xc0] sm:$0xff] }
  0xea   :  { %v336_v8 = vrot.slane %v320_v42, 4  ;;  %v337_v47 = vrot.slane %v325_v43, 4  ;;  %v439_v48 = vrot.slane %v427_v45, 4  ;;  %590 = vmatpush.bf16.msra.mxu1 %v531_v39  ;;  %v522_v63 = vld [vmem:[#allocation2 + $0xe0] sm:$0xf]  ;;  %v530_v9 = vpack.c.bf16 %v512_v36, %v506_v61 }
  0xeb   :  { %162 = vst [vmem:[#allocation2 + $0x18] sm:$0xf0] %v150_v41  ;;  %603 = vmatpush.bf16.msra.mxu2 %v532_v40  ;;  %v518_v50 = vld [vmem:[#allocation2 + $0x58] sm:$0xf]  ;;  %v540_v10 = vpack.c.bf16 %v522_v63, %v522_v63 }
  0xec   :  { %348 = vst [vmem:[#allocation2 + $0x8] sm:$0xf0] %v336_v8  ;;  %v536_v52 = vpack.c.bf16 %v518_v50, %v518_v50  ;;  %v523_v37 = vld [vmem:[#allocation2 + $0x20] sm:$0xf] }
  0xed   :  { %349 = vst [vmem:[#allocation2 + $0x78] sm:$0xf0] %v337_v47  ;;  %v541_v59 = vpack.c.bf16 %v523_v37, %v523_v37  ;;  %v566_v22 = vsel %vm552_vm8, %v540_v10, 0  ;;  %v509_v8 = vld [vmem:[#allocation2 + $0x40] sm:$0xff] }
  0xee   :  { %451 = vst [vmem:[#allocation2 + $0xa0] sm:$0xf0] %v439_v48  ;;  %v554_v0 = vsel %vm552_vm8, %v536_v52, 0  ;;  %591 = vmatpush.bf16.msra.mxu1 %v525_v53 }
  0xef   :  { %576 = vmatpush.bf16.msra.mxu0 %v554_v0  ;;  %604 = vmatpush.bf16.msra.mxu2 %v526_v58  ;;  %v569_v2 = vsel %vm552_vm8, %v541_v59, 0  ;;  %v189_v3 = vpop.permute.xlu2 %188  ;;  %v56_v59 = vld [vmem:[%s1922_s5] sm:$0x3f] }
  0xf0   :  { %v197_v62 = vsel %vm194_vm2, %v1475_v16, %v189_v3  ;;  %v131_v4 = vpop.permute.xlu0 %130  ;;  %v233_v7 = vpop.permute.xlu1 %232  ;;  %v657_v63 = vperm.slane %v56_v59, 1 }
  0xf1   :  { %204 = vst [vmem:[#allocation2 + $0x88] sm:$0xf] %v197_v62  ;;  %1165 = vmatmul.msk.bf16.vlgmr.msra.gmra.mxu1 %vm548_vm9, %v1577_v1  ;;  %v135_v11 = vsel %vm134_vm1, %v131_v4, %v1473_v15  ;;  %v136_v13 = vsel %vm134_vm1, %v129_v30, %v131_v4  ;;  %v237_v14 = vsel %vm236_vm3, %v233_v7, %v1468_v12  ;;  %v658_v4 = vperm.slane %v56_v59, 2 }
  0xf2   :  { %641 = vmatpush.bf16.msrb.mxu1 %v569_v2  ;;  %1166 = vmatmul.msk.bf16.vlgmr.msra.gmra.mxu2 %vm548_vm9, %v1577_v1  ;;  %v151_v16 = vrot.slane %v136_v13, 4  ;;  %v152_v6 = vrot.slane %v135_v11, 4  ;;  %v254_v17 = vrot.slane %v237_v14, 4  ;;  %v524_v15 = vpack.c.bf16 %v500_v19, %v494_v18 }
  0xf3   :  { %577 = vmatpush.bf16.msra.mxu0 %v530_v9  ;;  %v510_v49 = vld [vmem:[#allocation2 + $0x8] sm:$0xff]  ;;  %v656_v11 = vperm.slane %v56_v59, 0 }
  0xf4   :  { %163 = vst [vmem:[#allocation2 + $0x50] sm:$0xf0] %v151_v16  ;;  %v511_v20 = vld [vmem:[#allocation2 + $0x78] sm:$0xff] }
  0xf5   :  { %164 = vst [vmem:[#allocation2 + $0x68] sm:$0xf0] %v152_v6  ;;  %v517_v21 = vld [vmem:[#allocation2 + $0xa0] sm:$0xff] }
  0xf6   :  { %266 = vst [vmem:[#allocation2 + $0xb8] sm:$0xf0] %v254_v17  ;;  %v535_v23 = vpack.c.bf16 %v517_v21, %v511_v20  ;;  %v661_v20 = vperm.slane %v56_v59, 5 }
  0xf7   :  { %578 = vmatpush.bf16.msra.mxu0 %v524_v15 }
  0xf8   :  { %642 = vmatpush.bf16.msrb.mxu1 %v535_v23  ;;  %v87_v12 = vpop.permute.xlu0 %86  ;;  %v191_v25 = vpop.permute.xlu1 %190 }
  0xf9   :  { %v93_v26 = vsel %vm92_vm0, %v87_v12, %v1529_v55  ;;  %v195_v27 = vsel %vm194_vm2, %v191_v25, %v1511_v44  ;;  %v196_v28 = vsel %vm194_vm2, %v189_v3, %v191_v25  ;;  %v660_v25 = vperm.slane %v56_v59, 4 }
  0xfa   :  { %104 = vst [vmem:[#allocation2 + $0x68] sm:$0xf] %v93_v26  ;;  %1164 = vmatmul.msk.bf16.vlgmr.msra.gmra.mxu0 %vm548_vm9, %v1577_v1 }
  0xfb   :  { %628 = vmatpush.bf16.msrb.mxu0 %v566_v22  ;;  %205 = vst [vmem:[#allocation2 + $0xe8] sm:$0xf] %v196_v28 }
  0xfc   :  { %206 = vst [vmem:[#allocation2 + $0xb8] sm:$0xf] %v195_v27 }
 0x100   :  { %v418_v29 = vpop.permute.xlu0 %417  ;;  %v376_v30 = vpop.permute.xlu1 %375 }
 0x101   :  { %v422_v32 = vsel %vm421_vm5, %v418_v29, %v1562_v38  ;;  %v423_v55 = vsel %vm421_vm5, %v1493_v31, %v418_v29  ;;  %v380_v44 = vsel %vm379_vm6, %v376_v30, %v1527_v54  ;;  %v381_v33 = vsel %vm379_vm6, %v1488_v24, %v376_v30  ;;  %v499_v34 = vld [vmem:[#allocation2 + $0x68] sm:$0xff] }
 0x102   :  { %v437_v35 = vrot.slane %v423_v55, 4  ;;  %v438_v39 = vrot.slane %v422_v32, 4  ;;  %389 = vst [vmem:[#allocation2 + $0x28] sm:$0xf] %v381_v33  ;;  %v659_v30 = vperm.slane %v56_v59, 3 }
 0x103   :  { %390 = vst [vmem:[#allocation2 + $0x90] sm:$0xf] %v380_v44  ;;  %v505_v40 = vld [vmem:[#allocation2 + $0xb8] sm:$0xff] }
 0x104   :  { %449 = vst [vmem:[#allocation2 + $0x28] sm:$0xf0] %v437_v35  ;;  %v529_v38 = vpack.c.bf16 %v505_v40, %v499_v34 }
 0x105   :  { %450 = vst [vmem:[#allocation2 + $0x90] sm:$0xf0] %v438_v39 }
 0x106   :  { %643 = vmatpush.bf16.msrb.mxu1 %v529_v38 }
 0x108   :  { %v231_v41 = vpop.permute.xlu0 %230  ;;  %v85_v31 = vpop.permute.xlu1 %84 }
 0x109   :  { %1169 = vmatmul.msk.bf16.vlgmr.msrb.gmra.mxu1 %vm548_vm9, %v1577_v1  ;;  %v238_v54 = vsel %vm236_vm3, %v231_v41, %v233_v7  ;;  %v239_v24 = vsel %vm236_vm3, %v1450_v5, %v231_v41  ;;  %v94_v42 = vsel %vm92_vm0, %v85_v31, %v87_v12  ;;  %v95_v43 = vsel %vm92_vm0, %v1415_v57, %v85_v31 }
 0x10a   :  { %v252_v45 = vrot.slane %v239_v24, 4  ;;  %v253_v46 = vrot.slane %v238_v54, 4  ;;  %102 = vst [vmem:[#allocation2 + $0x18] sm:$0xf] %v95_v43 }
 0x10b   :  { %103 = vst [vmem:[#allocation2 + $0x50] sm:$0xf] %v94_v42  ;;  %v515_v47 = vld [vmem:[#allocation2 + $0x28] sm:$0xff] }
 0x10c   :  { %264 = vst [vmem:[#allocation2 + $0x88] sm:$0xf0] %v252_v45  ;;  %v533_v48 = vpack.c.bf16 %v515_v47, %v509_v8  ;;  %v516_v50 = vld [vmem:[#allocation2 + $0x90] sm:$0xff] }
 0x10d   :  { %265 = vst [vmem:[#allocation2 + $0xe8] sm:$0xf0] %v253_v46  ;;  %v534_v51 = vpack.c.bf16 %v516_v50, %v510_v49 }
 0x10e   :  { %616 = vmatpush.bf16.msra.mxu3 %v533_v48 }
 0x10f   :  { %629 = vmatpush.bf16.msrb.mxu0 %v534_v51 }
 0x111   :  { %v497_v5 = vld [vmem:[#allocation2 + $0x18] sm:$0xff] }
 0x112   :  { %v498_v56 = vld [vmem:[#allocation2 + $0x50] sm:$0xff] }
 0x113   :  { %v503_v52 = vld [vmem:[#allocation2 + $0x88] sm:$0xff] }
 0x114   :  { %v527_v53 = vpack.c.bf16 %v503_v52, %v497_v5  ;;  %v504_v37 = vld [vmem:[#allocation2 + $0xe8] sm:$0xff] }
 0x115   :  { %v528_v57 = vpack.c.bf16 %v504_v37, %v498_v56 }
 0x116   :  { %617 = vmatpush.bf16.msra.mxu3 %v527_v53 }
 0x117   :  { %630 = vmatpush.bf16.msrb.mxu0 %v528_v57 }
 0x119   :  { %1167 = vmatmul.msk.bf16.vlgmr.msra.gmra.mxu3 %vm548_vm9, %v1577_v1 }
 0x11a   :  { %1168 = vmatmul.msk.bf16.vlgmr.msrb.gmra.mxu0 %vm548_vm9, %v1577_v1 }
 0x144   :  { %v546_v58 = vpop.permute.xlu0 %545 }
 0x16e   :  { %v593_v61 = vpop.f32.mrf.mxu1 }
 0x16f   :  { %v594_v36 = vadd.f32 %v593_v61, %v546_v58 }
 0x171   :  { %v650_v0 = vmax.f32 %v594_v36, 0.0 }
 0x173   :  { %v669_v2 = vmul.f32 %v657_v63, %v650_v0 }
 0x175   :  { %v606_v3 = vpop.f32.mrf.mxu2  ;;  %808 = vst [vmem:[#allocation2 + $0xa8] sm:$0xf] %v669_v2  ;;  %815 = vrot.lane.b32.xlu2 %v669_v2, %s1274_s9  ;;  %923 = vrot.lane.b32.xlu1 %v669_v2, %s1277_s12 }
 0x176   :  { %v607_v62 = vadd.f32 %v606_v3, %v546_v58  ;;  %v595_v7 = vpop.f32.mrf.mxu1 }
 0x177   :  { %v580_v1 = vpop.f32.mrf.mxu0 }
 0x178   :  { %v651_v9 = vmax.f32 %v607_v62, 0.0  ;;  %v581_v10 = vadd.f32 %v580_v1, %v546_v58 }
 0x17a   :  { %v1639_v13 = vmul.f32 %v658_v4, %v651_v9  ;;  %v649_v14 = vmax.f32 %v581_v10, 0.0 }
 0x17c   :  { %809 = vst [vmem:[#allocation2 + $0x70] sm:$0xf] %v1639_v13  ;;  %v668_v16 = vmul.f32 %v656_v11, %v649_v14 }
 0x17d   :  { %701 = vrot.lane.b32.xlu2 %v669_v2, %s1271_s2  ;;  %v608_v6 = vpop.f32.mrf.mxu2 }
 0x17e   :  { %807 = vst [vmem:[#allocation2 + $0x60] sm:$0xf] %v668_v16  ;;  %813 = vrot.lane.b32.xlu0 %v668_v16, %s1274_s9  ;;  %921 = vrot.lane.b32.xlu1 %v668_v16, %s1277_s12 }
 0x17f   :  { %v582_v17 = vpop.f32.mrf.mxu0 }
 0x185   :  { %855 = vrot.lane.b32.xlu2 %v668_v16, %s1275_s10 }
 0x186   :  { %v645_v18 = vpop.f32.mrf.mxu1  ;;  %879 = vrot.lane.b32.xlu0 %v668_v16, %s1276_s11  ;;  %881 = vrot.lane.b32.xlu1 %v669_v2, %s1276_s11 }
 0x187   :  { %v646_v19 = vadd.f32 %v645_v18, %v546_v58 }
 0x189   :  { %v654_v15 = vmax.f32 %v646_v19, 0.0 }
 0x18b   :  { %v673_v21 = vmul.f32 %v661_v20, %v654_v15 }
 0x18d   :  { %812 = vst [vmem:[#allocation2 + $0x78] sm:$0xf] %v673_v21  ;;  %925 = vrot.lane.b32.xlu2 %v1639_v13, %s1277_s12 }
 0x18e   :  { %765 = vrot.lane.b32.xlu0 %v668_v16, %s1273_s8  ;;  %857 = vrot.lane.b32.xlu1 %v669_v2, %s1275_s10  ;;  %v647_v22 = vpop.f32.mrf.mxu1 }
 0x195   :  { %883 = vrot.lane.b32.xlu2 %v1639_v13, %s1276_s11 }
 0x196   :  { %675 = vrot.lane.b32.xlu0 %v668_v16, %s1270_s0  ;;  %699 = vrot.lane.b32.xlu1 %v668_v16, %s1271_s2 }
 0x197   :  { %v632_v23 = vpop.f32.mrf.mxu0 }
 0x198   :  { %v633_v12 = vadd.f32 %v632_v23, %v546_v58 }
 0x19a   :  { %v653_v26 = vmax.f32 %v633_v12, 0.0 }
 0x19c   :  { %v672_v27 = vmul.f32 %v660_v25, %v653_v26  ;;  %v619_v28 = vpop.f32.mrf.mxu3 }
 0x19d   :  { %v620_v29 = vadd.f32 %v619_v28, %v546_v58  ;;  %859 = vrot.lane.b32.xlu2 %v1639_v13, %s1275_s10 }
 0x19e   :  { %811 = vst [vmem:[#allocation2 + $0x8] sm:$0xf] %v672_v27  ;;  %741 = vrot.lane.b32.xlu0 %v668_v16, %s1272_s7  ;;  %767 = vrot.lane.b32.xlu1 %v669_v2, %s1273_s8 }
 0x19f   :  { %v652_v32 = vmax.f32 %v620_v29, 0.0  ;;  %v634_v55 = vpop.f32.mrf.mxu0 }
 0x1a1   :  { %v671_v44 = vmul.f32 %v659_v30, %v652_v32 }
 0x1a3   :  { %810 = vst [vmem:[#allocation2 + $0x40] sm:$0xf] %v671_v44 }
 0x1a4   :  { %v621_v33 = vpop.f32.mrf.mxu3 }
 0x1a5   :  { %705 = vrot.lane.b32.xlu2 %v671_v44, %s1271_s2 }
 0x1a6   :  { %817 = vrot.lane.b32.xlu0 %v1639_v13, %s1274_s9  ;;  %677 = vrot.lane.b32.xlu1 %v669_v2, %s1270_s0 }
 0x1ad   :  { %819 = vrot.lane.b32.xlu2 %v671_v44, %s1274_s9 }
 0x1ae   :  { %927 = vrot.lane.b32.xlu0 %v671_v44, %s1277_s12  ;;  %743 = vrot.lane.b32.xlu1 %v669_v2, %s1272_s7 }
 0x1b5   :  { %747 = vrot.lane.b32.xlu2 %v671_v44, %s1272_s7 }
 0x1b6   :  { %885 = vrot.lane.b32.xlu0 %v671_v44, %s1276_s11  ;;  %771 = vrot.lane.b32.xlu1 %v671_v44, %s1273_s8 }
 0x1bd   :  { %709 = vrot.lane.b32.xlu2 %v673_v21, %s1271_s2 }
 0x1be   :  { %861 = vrot.lane.b32.xlu0 %v671_v44, %s1275_s10  ;;  %681 = vrot.lane.b32.xlu1 %v671_v44, %s1270_s0 }
 0x1c5   :  { %775 = vrot.lane.b32.xlu2 %v673_v21, %s1273_s8 }
 0x1c6   :  { %685 = vrot.lane.b32.xlu0 %v673_v21, %s1270_s0  ;;  %703 = vrot.lane.b32.xlu1 %v1639_v13, %s1271_s2 }
 0x1cd   :  { %931 = vrot.lane.b32.xlu2 %v673_v21, %s1277_s12 }
 0x1ce   :  { %929 = vrot.lane.b32.xlu0 %v672_v27, %s1277_s12  ;;  %751 = vrot.lane.b32.xlu1 %v673_v21, %s1272_s7 }
 0x1cf   :  { %v1680_v34 = vpop.permute.xlu2 %815 }
 0x1d5   :  { %889 = vrot.lane.b32.xlu2 %v673_v21, %s1276_s11 }
 0x1d6   :  { %821 = vrot.lane.b32.xlu0 %v672_v27, %s1274_s9  ;;  %823 = vrot.lane.b32.xlu1 %v673_v21, %s1274_s9 }
 0x1d7   :  { %v1685_v35 = vpop.permute.xlu2 %701 }
 0x1dd   :  { %887 = vrot.lane.b32.xlu2 %v672_v27, %s1276_s11 }
 0x1de   :  { %863 = vrot.lane.b32.xlu0 %v672_v27, %s1275_s10  ;;  %865 = vrot.lane.b32.xlu1 %v673_v21, %s1275_s10 }
 0x1df   :  { %v1690_v39 = vpop.permute.xlu2 %855 }
 0x1e5   :  { %773 = vrot.lane.b32.xlu2 %v672_v27, %s1273_s8 }
 0x1e6   :  { %749 = vrot.lane.b32.xlu0 %v672_v27, %s1272_s7  ;;  %707 = vrot.lane.b32.xlu1 %v672_v27, %s1271_s2 }
 0x1e7   :  { %v924_v40 = vpop.permute.xlu1 %923  ;;  %v1695_v38 = vpop.permute.xlu2 %925 }
 0x1e8   :  { %v936_v41 = vsel %vm481_vm7, %v924_v40, %v1695_v38 }
 0x1e9   :  { %940 = vst [vmem:[#allocation2 + $0xd0] sm:$0xf] %v936_v41 }
 0x1ed   :  { %769 = vrot.lane.b32.xlu2 %v1639_v13, %s1273_s8 }
 0x1ee   :  { %679 = vrot.lane.b32.xlu0 %v1639_v13, %s1270_s0  ;;  %683 = vrot.lane.b32.xlu1 %v672_v27, %s1270_s0 }
 0x1ef   :  { %v1705_v31 = vpop.permute.xlu2 %883 }
 0x1f0   :  { %v1707_v54 = vpop.permute.xlu0 %813  ;;  %v1709_v24 = vpop.permute.xlu1 %921  ;;  %v970_v42 = vld [vmem:[#allocation2 + $0xd0] sm:$0xf] }
 0x1f1   :  { %v829_v43 = vsel %vm319_vm4, %v1707_v54, %v1680_v34  ;;  %v937_v45 = vsel %vm481_vm7, %v1709_v24, %v924_v40  ;;  %v988_v46 = vpack.c.bf16 %v970_v42, %v970_v42 }
 0x1f2   :  { %v837_v8 = vrot.slane %v829_v43, 4  ;;  %939 = vst [vmem:[#allocation2 + $0x58] sm:$0xf] %v937_v45 }
 0x1f3   :  { %v1006_v47 = vsel %vm552_vm8, %v988_v46, 0 }
 0x1f4   :  { %849 = vst [vmem:[#allocation2 + $0x60] sm:$0xf0] %v837_v8  ;;  %1038 = vmatpush.bf16.msrb.mxu3 %v1006_v47 }
 0x1f6   :  { %745 = vrot.lane.b32.xlu1 %v1639_v13, %s1272_s7 }
 0x1f7   :  { %v1721_v48 = vpop.permute.xlu2 %859 }
 0x1f8   :  { %v1723_v49 = vpop.permute.xlu0 %879  ;;  %v882_v50 = vpop.permute.xlu1 %881 }
 0x1f9   :  { %v894_v51 = vsel %vm421_vm5, %v882_v50, %v1705_v31  ;;  %v895_v5 = vsel %vm421_vm5, %v1723_v49, %v882_v50  ;;  %v969_v52 = vld [vmem:[#allocation2 + $0x58] sm:$0xf] }
 0x1fa   :  { %v903_v53 = vrot.slane %v895_v5, 4  ;;  %v904_v56 = vrot.slane %v894_v51, 4  ;;  %v987_v37 = vpack.c.bf16 %v969_v52, %v969_v52 }
 0x1fb   :  { %v957_v4 = vld [vmem:[#allocation2 + $0x60] sm:$0xff] }
 0x1fc   :  { %915 = vst [vmem:[#allocation2 + $0xc0] sm:$0xf0] %v903_v53  ;;  %v1003_v57 = vsel %vm552_vm8, %v987_v37, 0 }
 0x1fd   :  { %916 = vst [vmem:[#allocation2 + $0x10] sm:$0xf0] %v904_v56  ;;  %1025 = vmatpush.bf16.msrb.mxu2 %v1003_v57 }
 0x1ff   :  { %v1732_v58 = vpop.permute.xlu2 %705 }
 0x200   :  { %v766_v59 = vpop.permute.xlu0 %765  ;;  %v858_v61 = vpop.permute.xlu1 %857 }
 0x201   :  { %v870_v36 = vsel %vm379_vm6, %v858_v61, %v1721_v48  ;;  %v871_v63 = vsel %vm379_vm6, %v1690_v39, %v858_v61 }
 0x202   :  { %873 = vst [vmem:[#allocation2 + $0xc0] sm:$0xf] %v871_v63 }
 0x203   :  { %874 = vst [vmem:[#allocation2 + $0x10] sm:$0xf] %v870_v36 }
 0x207   :  { %v1740_v0 = vpop.permute.xlu2 %819 }
 0x208   :  { %v1742_v2 = vpop.permute.xlu0 %675  ;;  %v700_v3 = vpop.permute.xlu1 %699 }
 0x209   :  { %v715_v62 = vsel %vm134_vm1, %v700_v3, %v1685_v35  ;;  %v963_v7 = vld [vmem:[#allocation2 + $0xc0] sm:$0xff] }
 0x20a   :  { %v724_v1 = vrot.slane %v715_v62, 4  ;;  %v981_v9 = vpack.c.bf16 %v963_v7, %v957_v4  ;;  %v964_v44 = vld [vmem:[#allocation2 + $0x10] sm:$0xff] }
 0x20c   :  { %736 = vst [vmem:[#allocation2] sm:$0xf0] %v724_v1  ;;  %1026 = vmatpush.bf16.msrb.mxu2 %v981_v9 }
 0x20f   :  { %v1747_v10 = vpop.permute.xlu2 %747 }
 0x210   :  { %v1749_v11 = vpop.permute.xlu0 %741  ;;  %v1751_v13 = vpop.permute.xlu1 %767 }
 0x211   :  { %v781_v14 = vsel %vm236_vm3, %v766_v59, %v1751_v13 }
 0x212   :  { %v790_v16 = vrot.slane %v781_v14, 4 }
 0x214   :  { %802 = vst [vmem:[#allocation2 + $0x48] sm:$0xf0] %v790_v16 }
 0x217   :  { %v1756_v6 = vpop.permute.xlu2 %709 }
 0x218   :  { %v716_v17 = vsel %vm134_vm1, %v1756_v6, %v700_v3  ;;  %v818_v18 = vpop.permute.xlu0 %817  ;;  %v1761_v19 = vpop.permute.xlu1 %677 }
 0x219   :  { %v723_v20 = vrot.slane %v716_v17, 4  ;;  %v827_v15 = vsel %vm319_vm4, %v818_v18, %v1740_v0  ;;  %v828_v21 = vsel %vm319_vm4, %v1680_v34, %v818_v18  ;;  %v691_v22 = vsel %vm92_vm0, %v1742_v2, %v1761_v19 }
 0x21a   :  { %v838_v23 = vrot.slane %v828_v21, 4  ;;  %v839_v12 = vrot.slane %v827_v15, 4  ;;  %694 = vst [vmem:[#allocation2] sm:$0xf] %v691_v22 }
 0x21b   :  { %735 = vst [vmem:[#allocation2 + $0xb0] sm:$0xf0] %v723_v20  ;;  %v1827_v20 = vld [vmem:[#allocation6] sm:$0x3] }
 0x21c   :  { %850 = vst [vmem:[#allocation2 + $0xa8] sm:$0xf0] %v838_v23 }
 0x21d   :  { %851 = vst [vmem:[#allocation2 + $0x70] sm:$0xf0] %v839_v12 }
 0x21f   :  { %v1773_v25 = vpop.permute.xlu2 %775 }
 0x220   :  { %v782_v26 = vsel %vm236_vm3, %v1773_v25, %v766_v59  ;;  %v1778_v27 = vpop.permute.xlu0 %927  ;;  %v1780_v28 = vpop.permute.xlu1 %743 }
 0x221   :  { %v789_v29 = vrot.slane %v782_v26, 4  ;;  %v935_v30 = vsel %vm481_vm7, %v1695_v38, %v1778_v27  ;;  %v757_v32 = vsel %vm194_vm2, %v1749_v11, %v1780_v28  ;;  %v946_v8 = vld [vmem:[#allocation2] sm:$0xff] }
 0x222   :  { %941 = vst [vmem:[#allocation2 + $0x98] sm:$0xf] %v935_v30 }
 0x223   :  { %801 = vst [vmem:[#allocation2 + $0x30] sm:$0xf0] %v789_v29  ;;  %v958_v55 = vld [vmem:[#allocation2 + $0xa8] sm:$0xff] }
 0x224   :  { %760 = vst [vmem:[#allocation2 + $0x48] sm:$0xf] %v757_v32  ;;  %v982_v33 = vpack.c.bf16 %v964_v44, %v958_v55  ;;  %v959_v1 = vld [vmem:[#allocation2 + $0x70] sm:$0xff] }
 0x226   :  { %1039 = vmatpush.bf16.msrb.mxu3 %v982_v33 }
 0x227   :  { %v932_v34 = vpop.permute.xlu2 %931 }
 0x228   :  { %v938_v40 = vsel %vm481_vm7, %v932_v34, %v1709_v24  ;;  %v886_v41 = vpop.permute.xlu0 %885  ;;  %v1793_v42 = vpop.permute.xlu1 %771 }
 0x229   :  { %944 = vst [vmem:[#allocation2 + $0x20] sm:$0xf] %v938_v40  ;;  %v893_v38 = vsel %vm421_vm5, %v1705_v31, %v886_v41  ;;  %v971_v43 = vld [vmem:[#allocation2 + $0x98] sm:$0xf] }
 0x22a   :  { %v905_v45 = vrot.slane %v893_v38, 4  ;;  %v989_v46 = vpack.c.bf16 %v971_v43, %v971_v43 }
 0x22b   :  { %v952_v47 = vld [vmem:[#allocation2 + $0x48] sm:$0xff] }
 0x22c   :  { %917 = vst [vmem:[#allocation2 + $0x38] sm:$0xf0] %v905_v45  ;;  %v976_v50 = vpack.c.bf16 %v952_v47, %v946_v8  ;;  %v1009_v51 = vsel %vm552_vm8, %v989_v46, 0 }
 0x22d   :  { %1051 = vmatpush.bf16.msra.mxu0 %v1009_v51 }
 0x22e   :  { %1040 = vmatpush.bf16.msrb.mxu3 %v976_v50 }
 0x22f   :  { %v890_v24 = vpop.permute.xlu2 %889 }
 0x230   :  { %v896_v5 = vsel %vm421_vm5, %v890_v24, %v1723_v49  ;;  %v1802_v52 = vpop.permute.xlu0 %861  ;;  %v1804_v53 = vpop.permute.xlu1 %681  ;;  %v974_v31 = vld [vmem:[#allocation2 + $0x20] sm:$0xf] }
 0x231   :  { %v908_v56 = vrot.slane %v896_v5, 4  ;;  %v869_v37 = vsel %vm379_vm6, %v1721_v48, %v1802_v52  ;;  %v992_v57 = vpack.c.bf16 %v974_v31, %v974_v31  ;;  %1171 = vmatmul.msk.bf16.vlgmr.msrb.gmra.mxu3 %vm548_vm9, %v1827_v20 }
 0x232   :  { %875 = vst [vmem:[#allocation2 + $0x38] sm:$0xf] %v869_v37 }
 0x233   :  { %920 = vst [vmem:[#allocation2 + $0xa0] sm:$0xf0] %v908_v56  ;;  %v1018_v59 = vsel %vm552_vm8, %v992_v57, 0 }
 0x234   :  { %1090 = vmatpush.bf16.msra.mxu3 %v1018_v59 }
 0x237   :  { %v888_v61 = vpop.permute.xlu2 %887 }
 0x238   :  { %v891_v49 = vsel %vm421_vm5, %v888_v61, %v890_v24  ;;  %v892_v36 = vsel %vm421_vm5, %v886_v41, %v888_v61  ;;  %v1815_v63 = vpop.permute.xlu0 %685  ;;  %v704_v3 = vpop.permute.xlu1 %703  ;;  %v993_v61 = vld [vmem:[%s1921_s4] sm:$0xf]  ;;  %s1279_s4 = smov [#allocation8]  }
 0x239   :  { %v906_v62 = vrot.slane %v892_v36, 4  ;;  %v907_v4 = vrot.slane %v891_v49, 4  ;;  %v692_v48 = vsel %vm92_vm0, %v1815_v63, %v1742_v2  ;;  %v713_v7 = vsel %vm134_vm1, %v704_v3, %v1732_v58  ;;  %v965_v9 = vld [vmem:[#allocation2 + $0x38] sm:$0xff]  ;;  %996 = vperm.xlu2 %1189, %v993_v61   ;;  %s1151_s18 = sshll.u32 %s1279_s4, 4  ;;  %s1152_s18 = int_to_ptr.vmem [resolvable:$true] %s1151_s18 }
 0x23a   :  { %693 = vst [vmem:[#allocation2 + $0xb0] sm:$0xf] %v692_v48  ;;  %v714_v14 = vsel %vm134_vm1, %v1685_v35, %v704_v3  ;;  %v726_v16 = vrot.slane %v713_v7, 4  ;;  %v983_v17 = vpack.c.bf16 %v965_v9, %v959_v1 }
 0x23b   :  { %918 = vst [vmem:[#allocation2 + $0x28] sm:$0xf0] %v906_v62  ;;  %v725_v18 = vrot.slane %v714_v14, 4 }
 0x23c   :  { %919 = vst [vmem:[#allocation2 + $0x90] sm:$0xf0] %v907_v4  ;;  %1052 = vmatpush.bf16.msra.mxu0 %v983_v17 }
 0x23d   :  { %737 = vst [vmem:[#allocation2 + $0xd8] sm:$0xf0] %v725_v18 }
 0x23e   :  { %738 = vst [vmem:[#allocation2 + $0x18] sm:$0xf0] %v726_v16 }
 0x23f   :  { %v774_v2 = vpop.permute.xlu2 %773 }
 0x240   :  { %v777_v15 = vsel %vm236_vm3, %v774_v2, %v1773_v25  ;;  %v778_v35 = vsel %vm236_vm3, %v1793_v42, %v774_v2  ;;  %v930_v21 = vpop.permute.xlu0 %929  ;;  %v752_v22 = vpop.permute.xlu1 %751 }
 0x241   :  { %v793_v23 = vrot.slane %v778_v35, 4  ;;  %v794_v12 = vrot.slane %v777_v15, 4  ;;  %v934_v26 = vsel %vm481_vm7, %v1778_v27, %v930_v21  ;;  %v933_v29 = vsel %vm481_vm7, %v930_v21, %v932_v34  ;;  %v945_v47 = vld [vmem:[#allocation2 + $0xb0] sm:$0xff] }
 0x242   :  { %942 = vst [vmem:[#allocation2 + $0xc8] sm:$0xf] %v934_v26  ;;  %v758_v25 = vsel %vm194_vm2, %v752_v22, %v1749_v11 }
 0x243   :  { %805 = vst [vmem:[#allocation2 + $0xe8] sm:$0xf0] %v793_v23 }
 0x244   :  { %806 = vst [vmem:[#allocation2 + $0xb8] sm:$0xf0] %v794_v12 }
 0x245   :  { %943 = vst [vmem:[#allocation2 + $0xe0] sm:$0xf] %v933_v29 }
 0x246   :  { %759 = vst [vmem:[#allocation2 + $0x30] sm:$0xf] %v758_v25 }
 0x247   :  { %v770_v30 = vpop.permute.xlu2 %769 }
 0x248   :  { %v779_v32 = vsel %vm236_vm3, %v770_v30, %v1793_v42  ;;  %v780_v27 = vsel %vm236_vm3, %v1751_v13, %v770_v30  ;;  %v822_v55 = vpop.permute.xlu0 %821  ;;  %v824_v44 = vpop.permute.xlu1 %823 }
 0x249   :  { %v791_v33 = vrot.slane %v780_v27, 4  ;;  %v792_v34 = vrot.slane %v779_v32, 4  ;;  %v826_v11 = vsel %vm319_vm4, %v1740_v0, %v822_v55  ;;  %v825_v40 = vsel %vm319_vm4, %v822_v55, %v824_v44  ;;  %v972_v41 = vld [vmem:[#allocation2 + $0xc8] sm:$0xf] }
 0x24a   :  { %v840_v38 = vrot.slane %v826_v11, 4  ;;  %v830_v42 = vsel %vm319_vm4, %v824_v44, %v1707_v54  ;;  %v841_v43 = vrot.slane %v825_v40, 4  ;;  %v990_v45 = vpack.c.bf16 %v972_v41, %v972_v41  ;;  %v1104_v11 = vld.sshfl [vmem:[#allocation1 + $0x8] sm:$0xff pattern:$0x75316420] }
 0x24b   :  { %803 = vst [vmem:[#allocation2 + $0x80] sm:$0xf0] %v791_v33  ;;  %v842_v13 = vrot.slane %v830_v42, 4  ;;  %v1103_v42 = vld.sshfl [vmem:[#allocation1] sm:$0xff pattern:$0x75316420] }
 0x24c   :  { %804 = vst [vmem:[#allocation2 + $0x88] sm:$0xf0] %v792_v34  ;;  %v1012_v46 = vsel %vm552_vm8, %v990_v45, 0  ;;  %v973_v8 = vld [vmem:[#allocation2 + $0xe0] sm:$0xf] }
 0x24d   :  { %852 = vst [vmem:[#allocation2 + $0x40] sm:$0xf0] %v840_v38  ;;  %v951_v0 = vld [vmem:[#allocation2 + $0x30] sm:$0xff]  ;;  %1064 = vmatpush.bf16.msra.mxu1 %v1012_v46  ;;  %v991_v50 = vpack.c.bf16 %v973_v8, %v973_v8 }
 0x24e   :  { %853 = vst [vmem:[#allocation2 + $0x8] sm:$0xf0] %v841_v43  ;;  %v975_v51 = vpack.c.bf16 %v951_v0, %v945_v47 }
 0x24f   :  { %854 = vst [vmem:[#allocation2 + $0x78] sm:$0xf0] %v842_v13  ;;  %v1015_v24 = vsel %vm552_vm8, %v991_v50, 0  ;;  %v1108_v50 = vld.sshfl [vmem:[#allocation1 + $0x28] sm:$0xff pattern:$0x75316420] }
 0x250   :  { %1027 = vmatpush.bf16.msrb.mxu2 %v975_v51  ;;  %v864_v54 = vpop.permute.xlu0 %863  ;;  %v866_v5 = vpop.permute.xlu1 %865 }
 0x251   :  { %v868_v31 = vsel %vm379_vm6, %v1802_v52, %v864_v54  ;;  %v867_v56 = vsel %vm379_vm6, %v864_v54, %v866_v5  ;;  %v872_v37 = vsel %vm379_vm6, %v866_v5, %v1690_v39 }
 0x252   :  { %876 = vst [vmem:[#allocation2 + $0x28] sm:$0xf] %v868_v31  ;;  %v1105_v31 = vld.sshfl [vmem:[#allocation1 + $0x10] sm:$0xff pattern:$0x75316420] }
 0x253   :  { %877 = vst [vmem:[#allocation2 + $0x90] sm:$0xf] %v867_v56  ;;  %1170 = vmatmul.msk.bf16.vlgmr.msrb.gmra.mxu2 %vm548_vm9, %v1827_v20 }
 0x254   :  { %1077 = vmatpush.bf16.msra.mxu2 %v1015_v24  ;;  %878 = vst [vmem:[#allocation2 + $0xa0] sm:$0xf] %v872_v37  ;;  %v960_v3 = vld [vmem:[#allocation2 + $0x40] sm:$0xff]  ;;  %v1106_v37 = vld.sshfl [vmem:[#allocation1 + $0x18] sm:$0xff pattern:$0x75316420] }
 0x255   :  { %v961_v1 = vld [vmem:[#allocation2 + $0x8] sm:$0xff] }
 0x256   :  { %v962_v16 = vld [vmem:[#allocation2 + $0x78] sm:$0xff] }
 0x258   :  { %v750_v57 = vpop.permute.xlu0 %749  ;;  %v708_v59 = vpop.permute.xlu1 %707 }
 0x259   :  { %v753_v52 = vsel %vm194_vm2, %v750_v57, %v752_v22  ;;  %v754_v49 = vsel %vm194_vm2, %v1747_v10, %v750_v57  ;;  %v711_v39 = vsel %vm134_vm1, %v708_v59, %v1756_v6  ;;  %v712_v36 = vsel %vm134_vm1, %v1732_v58, %v708_v59  ;;  %v966_v62 = vld [vmem:[#allocation2 + $0x28] sm:$0xff] }
 0x25a   :  { %763 = vst [vmem:[#allocation2 + $0xe8] sm:$0xf] %v754_v49  ;;  %v727_v4 = vrot.slane %v712_v36, 4  ;;  %v728_v48 = vrot.slane %v711_v39, 4  ;;  %v984_v7 = vpack.c.bf16 %v966_v62, %v960_v3  ;;  %v967_v9 = vld [vmem:[#allocation2 + $0x90] sm:$0xff] }
 0x25b   :  { %764 = vst [vmem:[#allocation2 + $0xb8] sm:$0xf] %v753_v52  ;;  %v985_v14 = vpack.c.bf16 %v967_v9, %v961_v1  ;;  %v968_v17 = vld [vmem:[#allocation2 + $0xa0] sm:$0xff] }
 0x25c   :  { %739 = vst [vmem:[#allocation2 + $0x50] sm:$0xf0] %v727_v4  ;;  %1065 = vmatpush.bf16.msra.mxu1 %v984_v7  ;;  %v986_v6 = vpack.c.bf16 %v968_v17, %v962_v16 }
 0x25d   :  { %740 = vst [vmem:[#allocation2 + $0x68] sm:$0xf0] %v728_v48  ;;  %1078 = vmatpush.bf16.msra.mxu2 %v985_v14 }
 0x25e   :  { %1091 = vmatpush.bf16.msra.mxu3 %v986_v6 }
 0x260   :  { %v680_v58 = vpop.permute.xlu0 %679  ;;  %v684_v18 = vpop.permute.xlu1 %683 }
 0x261   :  { %v689_v2 = vsel %vm92_vm0, %v680_v58, %v1804_v53  ;;  %v690_v15 = vsel %vm92_vm0, %v1761_v19, %v680_v58  ;;  %v688_v35 = vsel %vm92_vm0, %v1804_v53, %v684_v18  ;;  %v687_v21 = vsel %vm92_vm0, %v684_v18, %v1815_v63  ;;  %v955_v12 = vld [vmem:[#allocation2 + $0xe8] sm:$0xff] }
 0x262   :  { %695 = vst [vmem:[#allocation2 + $0xd8] sm:$0xf] %v690_v15  ;;  %v956_v25 = vld [vmem:[#allocation2 + $0xb8] sm:$0xff] }
 0x263   :  { %696 = vst [vmem:[#allocation2 + $0x18] sm:$0xf] %v689_v2 }
 0x264   :  { %697 = vst [vmem:[#allocation2 + $0x50] sm:$0xf] %v688_v35 }
 0x265   :  { %698 = vst [vmem:[#allocation2 + $0x68] sm:$0xf] %v687_v21 }
 0x268   :  { %v746_v22 = vpop.permute.xlu1 %745 }
 0x269   :  { %v755_v23 = vsel %vm194_vm2, %v746_v22, %v1747_v10  ;;  %v756_v19 = vsel %vm194_vm2, %v1780_v28, %v746_v22  ;;  %v947_v30 = vld [vmem:[#allocation2 + $0xd8] sm:$0xff] }
 0x26a   :  { %761 = vst [vmem:[#allocation2 + $0x80] sm:$0xf] %v756_v19  ;;  %v948_v10 = vld [vmem:[#allocation2 + $0x18] sm:$0xff] }
 0x26b   :  { %762 = vst [vmem:[#allocation2 + $0x88] sm:$0xf] %v755_v23  ;;  %v949_v53 = vld [vmem:[#allocation2 + $0x50] sm:$0xff] }
 0x26c   :  { %v979_v26 = vpack.c.bf16 %v955_v12, %v949_v53  ;;  %v950_v29 = vld [vmem:[#allocation2 + $0x68] sm:$0xff] }
 0x26d   :  { %v980_v63 = vpack.c.bf16 %v956_v25, %v950_v29 }
 0x26e   :  { %1079 = vmatpush.bf16.msra.mxu2 %v979_v26 }
 0x26f   :  { %1092 = vmatpush.bf16.msra.mxu3 %v980_v63 }
 0x271   :  { %1174 = vmatmul.msk.bf16.vlgmr.msra.gmra.mxu2 %vm548_vm9, %v1827_v20  ;;  %v953_v32 = vld [vmem:[#allocation2 + $0x80] sm:$0xff] }
 0x272   :  { %1175 = vmatmul.msk.bf16.vlgmr.msra.gmra.mxu3 %vm548_vm9, %v1827_v20  ;;  %v977_v60 = vpack.c.bf16 %v953_v32, %v947_v30  ;;  %v954_v28 = vld [vmem:[#allocation2 + $0x88] sm:$0xff] }
 0x273   :  { %v978_v27 = vpack.c.bf16 %v954_v28, %v948_v10 }
 0x274   :  { %1053 = vmatpush.bf16.msra.mxu0 %v977_v60 }
 0x275   :  { %1066 = vmatpush.bf16.msra.mxu1 %v978_v27 }
 0x277   :  { %1172 = vmatmul.msk.bf16.vlgmr.msra.gmra.mxu0 %vm548_vm9, %v1827_v20 }
 0x278   :  { %1173 = vmatmul.msk.bf16.vlgmr.msra.gmra.mxu1 %vm548_vm9, %v1827_v20  ;;  %v1107_v20 = vld.sshfl [vmem:[#allocation1 + $0x20] sm:$0xff pattern:$0x75316420] }
 0x293   :  { %v997_v33 = vpop.permute.xlu2 %996 }
 0x2b4   :  { %v1042_v55 = vpop.f32.mrf.mxu3 }
 0x2b5   :  { %v1043_v34 = vadd.f32 %v1042_v55, %v997_v33 }
 0x2b7   :  { %v1116_v40 = vadd.f32 %v1104_v11, %v1043_v34 }
 0x2b9   :  { %v1122_v41 = vmax.f32 %v1116_v40, 0.0 }
 0x2bb   :  { %v1133_v13 = vrot.slane %v1122_v41, 4 }
 0x2bc   :  { %v1044_v44 = vpop.f32.mrf.mxu3 }
 0x2d6   :  { %v1029_v38 = vpop.f32.mrf.mxu2 }
 0x2d7   :  { %v1030_v43 = vadd.f32 %v1029_v38, %v997_v33 }
 0x2d9   :  { %v1115_v45 = vadd.f32 %v1103_v42, %v1030_v43 }
 0x2db   :  { %v1121_v46 = vmax.f32 %v1115_v45, 0.0 }
 0x2dd   :  { %v1137_v8 = vsel %vm1136_vm10, %v1121_v46, %v1133_v13 }
 0x2de   :  { %v1031_v47 = vpop.f32.mrf.mxu2  ;;  %1143 = vst [vmem:[#allocation8] sm:$0xff] %v1137_v8 }
 0x2f4   :  { %v1081_v0 = vpop.f32.mrf.mxu2  ;;  %v1055_v51 = vpop.f32.mrf.mxu0 }
 0x2f5   :  { %v1082_v24 = vadd.f32 %v1081_v0, %v997_v33  ;;  %v1094_v54 = vpop.f32.mrf.mxu3  ;;  %v1056_v5 = vadd.f32 %v1055_v51, %v997_v33  ;;  %v1068_v56 = vpop.f32.mrf.mxu1 }
 0x2f6   :  { %v1095_v57 = vadd.f32 %v1094_v54, %v997_v33  ;;  %v1069_v59 = vadd.f32 %v1068_v56, %v997_v33 }
 0x2f7   :  { %v1119_v61 = vadd.f32 %v1107_v20, %v1082_v24  ;;  %v1117_v49 = vadd.f32 %v1105_v31, %v1056_v5 }
 0x2f8   :  { %v1120_v52 = vadd.f32 %v1108_v50, %v1095_v57  ;;  %v1118_v39 = vadd.f32 %v1106_v37, %v1069_v59 }
 0x2f9   :  { %v1125_v36 = vmax.f32 %v1119_v61, 0.0  ;;  %v1123_v48 = vmax.f32 %v1117_v49, 0.0 }
 0x2fa   :  { %v1126_v3 = vmax.f32 %v1120_v52, 0.0  ;;  %v1124_v62 = vmax.f32 %v1118_v39, 0.0 }
 0x2fc   :  { %v1135_v4 = vrot.slane %v1126_v3, 4  ;;  %v1134_v7 = vrot.slane %v1124_v62, 4  ;;  %v1083_v1 = vpop.f32.mrf.mxu2  ;;  %v1057_v9 = vpop.f32.mrf.mxu0 }
 0x2fd   :  { %v1096_v14 = vpop.f32.mrf.mxu3  ;;  %v1070_v16 = vpop.f32.mrf.mxu1 }
 0x2fe   :  { %v1139_v17 = vsel %vm1136_vm10, %v1125_v36, %v1135_v4  ;;  %v1138_v6 = vsel %vm1136_vm10, %v1123_v48, %v1134_v7 }
 0x2ff   :  { %1145 = vst [vmem:[#allocation8 + $0x10] sm:$0xff] %v1139_v17 }
 0x300   :  { %1144 = vst [vmem:[#allocation8 + $0x8] sm:$0xff] %v1138_v6 }
 0x301   :  { %1156 = dma.vmem_to_hbm [thread:$0]  %s1152_s18, 384, %s1154_s21, [#allocation5]  }
 0x302   :  { %1266 = dma.done.wait [#allocation5], 384  }
 0x303   :  { %1267 = vsyncadd [#allocation5], 4294966912 }
 0x304   :  { %1161 = vsyncpa [#allocation4], 1 }
 0x305   :  { %1162 = vsyncpa [#allocation7], 1 }
 0x306   :  { %1163 = vsyncpa [#allocation5], 1 }

</bundles_post_ra>
